<compile_context>
chip_gen: v6e
topology: v6e:2x2x1
jax: 0.10.0
libtpu: 0.0.40
codegen_flags: <defaults>
</compile_context>

<pallas_src>
import jax
import jax.numpy as jnp
from jax.experimental import pallas as pl
from jax.experimental.pallas import tpu as pltpu

INPUT_SIZE = 4
HIDDEN_SIZE = 16
OUTPUT_SIZE = 2
NUM_LAYERS = 3


# ---------------- packed-weight layout (row offsets, all 8-aligned) ----------------
def _r8(n):
    return ((n + 7) // 8) * 8


ROW_W0IN = 0                                                    # (D, 4H)   [r|z|n|0]
ROW_B = _r8(ROW_W0IN + INPUT_SIZE)                              # row ROW_B + l = folded bias layer l
ROW_WH = _r8(ROW_B + NUM_LAYERS)                                # (L*H, 4H) hidden weights [r|z|0|n]
ROW_WIN = _r8(ROW_WH + NUM_LAYERS * HIDDEN_SIZE)                # ((L-1)*H, 4H) input weights l>=1
ROW_WFC = _r8(ROW_WIN + (NUM_LAYERS - 1) * HIDDEN_SIZE)         # (H, 4H) fc weight, cols >= O zero
ROW_BFC = _r8(ROW_WFC + HIDDEN_SIZE)                            # (1, 4H) fc bias, cols >= O zero
N_ROWS = _r8(ROW_BFC + 1)
assert OUTPUT_SIZE <= 4 * HIDDEN_SIZE, "fc output must fit in the 4H-wide packed buffer"


# ----------------------------------- Pallas kernel -----------------------------------
def _gru_kernel(x_ref, w_ref, out_ref):
    """Whole sequence in one invocation; recurrence statically unrolled by wavefront.

    Fused gate column layout of each 4H-wide pre-activation s:
      s[:, 0:H]   -> r   (input + hidden contributions, biases folded)
      s[:, H:2H]  -> z   (input + hidden contributions, biases folded)
      s[:, 2H:3H] -> i_n = W_in x + b_in
      s[:, 3H:4H] -> h_n = W_hn h + b_hn
    """
    H, L = HIDDEN_SIZE, NUM_LAYERS
    TB, D = x_ref.shape
    B = out_ref.shape[0]
    T = TB // B

    # ---- one-time weight loads (prologue, off the recurrent chain) ----
    w0_in = w_ref[ROW_W0IN:ROW_W0IN + D, :]                                  # (D, 4H)
    b0 = w_ref[ROW_B:ROW_B + 1, :]                                           # (1, 4H)
    w_h = [w_ref[ROW_WH + l * H:ROW_WH + (l + 1) * H, :] for l in range(L)]  # (H, 4H) each
    w_in = [None] + [w_ref[ROW_WIN + (l - 1) * H:ROW_WIN + l * H, :]
                     for l in range(1, L)]                                   # (H, 4H) each
    b = [None] + [w_ref[ROW_B + l:ROW_B + l + 1, :] for l in range(1, L)]    # (1, 4H) each
    w_fc = w_ref[ROW_WFC:ROW_WFC + H, :]                                     # (H, 4H)
    b_fc = w_ref[ROW_BFC:ROW_BFC + 1, :]                                     # (1, 4H)

    # ---- all layer-0 input projections in a single matmul; layer-0 bias folded here ----
    gi0 = jnp.dot(x_ref[...], w0_in, preferred_element_type=jnp.float32) + b0   # (T*B, 4H)

    def cell(s, h_prev):
        rz = jax.nn.sigmoid(s[:, 0:2 * H])           # one EUP call for both gates
        r = rz[:, 0:H]
        z = rz[:, H:2 * H]
        n = jnp.tanh(s[:, 2 * H:3 * H] + r * s[:, 3 * H:4 * H])
        return n + z * (h_prev - n)                  # == (1 - z) * n + z * h_prev

    # Hidden states carried as values (vregs); h0 = zeros like the PyTorch module.
    h = [jnp.zeros((B, H), jnp.float32) for _ in range(L)]

    # ---- wavefront schedule: cell (t, l) sits on wavefront w = t + l ----
    for wf in range(T + L - 1):                      # T+L-1 serial stages instead of T*L
        new_h = {}
        for l in range(L):
            t = wf - l
            if t < 0 or t >= T:
                continue
            if l == 0:
                s = gi0[t * B:(t + 1) * B, :] + jnp.dot(
                    h[0], w_h[0], preferred_element_type=jnp.float32)
            else:
                s = (jnp.dot(h[l - 1], w_in[l], preferred_element_type=jnp.float32)
                     + jnp.dot(h[l], w_h[l], preferred_element_type=jnp.float32)
                     + b[l])
            new_h[l] = cell(s, h[l])
        for l, v in new_h.items():                   # commit after the wavefront (snapshot reads)
            h[l] = v

    # ---- fused final Linear on the top layer's last hidden state ----
    y = jnp.dot(h[L - 1], w_fc, preferred_element_type=jnp.float32) + b_fc       # (B, 4H)
    out_ref[...] = y[:, :out_ref.shape[1]].astype(out_ref.dtype)


# ----------------------------------- weight packing -----------------------------------
def _pack_params(params):
    """Pack every weight/bias (gate-fused, transposed, biases folded) into one buffer."""
    H, D, O, L = HIDDEN_SIZE, INPUT_SIZE, OUTPUT_SIZE, NUM_LAYERS
    G = 4 * H
    buf = jnp.zeros((N_ROWS, G), jnp.float32)

    def in_part(w_ih):            # (3H, in) -> (in, 4H) cols [r|z|n|0]
        w = w_ih.T.astype(jnp.float32)
        return jnp.concatenate([w, jnp.zeros((w.shape[0], H), jnp.float32)], axis=1)

    def hid_part(w_hh):           # (3H, H) -> (H, 4H) cols [r|z|0|n]
        w = w_hh.T.astype(jnp.float32)
        return jnp.concatenate(
            [w[:, :2 * H], jnp.zeros((H, H), jnp.float32), w[:, 2 * H:]], axis=1)

    def fold_bias(b_ih, b_hh):    # -> (4H,)  [b_r(ih+hh) | b_z(ih+hh) | b_in | b_hn]
        return jnp.concatenate(
            [b_ih[:2 * H] + b_hh[:2 * H], b_ih[2 * H:], b_hh[2 * H:]]).astype(jnp.float32)

    buf = buf.at[ROW_W0IN:ROW_W0IN + D, :].set(in_part(params["w_ih"][0]))
    for l in range(L):
        buf = buf.at[ROW_B + l, :].set(fold_bias(params["b_ih"][l], params["b_hh"][l]))
        buf = buf.at[ROW_WH + l * H:ROW_WH + (l + 1) * H, :].set(hid_part(params["w_hh"][l]))
    for l in range(1, L):         # safe for NUM_LAYERS == 1 (loop is empty)
        buf = buf.at[ROW_WIN + (l - 1) * H:ROW_WIN + l * H, :].set(in_part(params["w_ih"][l]))
    buf = buf.at[ROW_WFC:ROW_WFC + H, :O].set(params["w_fc"].T.astype(jnp.float32))
    buf = buf.at[ROW_BFC, :O].set(params["b_fc"].astype(jnp.float32))
    return buf


# --------------------------------------- wrapper ---------------------------------------
def gru_forward(x, params):
    if x.ndim == 2:                      # mirrors x.unsqueeze(1) in the module
        x = x[:, None, :]
    x = x.astype(jnp.float32)
    B, T, D = x.shape

    # time-major, flattened so the kernel does all layer-0 projections in one matmul
    x2d = jnp.transpose(x, (1, 0, 2)).reshape(T * B, D)
    wbuf = _pack_params(params)

    vmem = pltpu.MemorySpace.VMEM
    return pl.pallas_call(
        _gru_kernel,
        out_shape=jax.ShapeDtypeStruct((B, OUTPUT_SIZE), jnp.float32),
        in_specs=[pl.BlockSpec(memory_space=vmem)] * 2,   # only 2 input DMAs
        out_specs=pl.BlockSpec(memory_space=vmem),
    )(x2d, wbuf)


# ------------------------------------ parameter init ------------------------------------
def init_params(key):
    """Deterministic init matching PyTorch shapes: U(-1/sqrt(H), 1/sqrt(H))."""
    H, D, O, L = HIDDEN_SIZE, INPUT_SIZE, OUTPUT_SIZE, NUM_LAYERS
    k = 1.0 / jnp.sqrt(H)
    keys = jax.random.split(key, 4 * L + 2)
    w_ih, w_hh, b_ih, b_hh = [], [], [], []
    for l in range(L):
        in_dim = D if l == 0 else H
        w_ih.append(jax.random.uniform(keys[4 * l + 0], (3 * H, in_dim), jnp.float32, -k, k))
        w_hh.append(jax.random.uniform(keys[4 * l + 1], (3 * H, H), jnp.float32, -k, k))
        b_ih.append(jax.random.uniform(keys[4 * l + 2], (3 * H,), jnp.float32, -k, k))
        b_hh.append(jax.random.uniform(keys[4 * l + 3], (3 * H,), jnp.float32, -k, k))
    w_fc = jax.random.uniform(keys[-2], (O, H), jnp.float32, -k, k)
    b_fc = jax.random.uniform(keys[-1], (O,), jnp.float32, -k, k)
    return {"w_ih": w_ih, "w_hh": w_hh, "b_ih": b_ih, "b_hh": b_hh,
            "w_fc": w_fc, "b_fc": b_fc}


# ----------------------------------- pure-JAX reference -----------------------------------
def gru_ref(x, params):
    if x.ndim == 2:
        x = x[:, None, :]
    x = x.astype(jnp.float32)
    B, T, _ = x.shape
    H = HIDDEN_SIZE
    h = [jnp.zeros((B, H), jnp.float32) for _ in range(NUM_LAYERS)]
    last = None
    for t in range(T):
        inp = x[:, t, :]
        for l in range(NUM_LAYERS):
            gi = inp @ params["w_ih"][l].T + params["b_ih"][l]
            gh = h[l] @ params["w_hh"][l].T + params["b_hh"][l]
            r = jax.nn.sigmoid(gi[:, :H] + gh[:, :H])
            z = jax.nn.sigmoid(gi[:, H:2 * H] + gh[:, H:2 * H])
            n = jnp.tanh(gi[:, 2 * H:] + r * gh[:, 2 * H:])
            h[l] = (1.0 - z) * n + z * h[l]
            inp = h[l]
        last = inp
    return last @ params["w_fc"].T + params["b_fc"]


if __name__ == "__main__":
    key = jax.random.PRNGKey(0)
    pkey, xkey = jax.random.split(key)
    params = init_params(pkey)
    x = jax.random.normal(xkey, (2, 8, INPUT_SIZE), jnp.float32)  # (batch=2, seq=8, feat=4)

    out = gru_forward(x, params)
    out = jax.block_until_ready(out)

    ref = gru_ref(x, params)
    assert out.shape == (2, OUTPUT_SIZE)
    assert jnp.allclose(out, ref, atol=1e-5, rtol=1e-5), (out, ref)
    print("KERNEL_OK")
</pallas_src>

<mosaic_0001>
module attributes {stable_mosaic.version = 11 : i64} {
  func.func @_gru_kernel(%arg0: memref<16x4xf32, #tpu.memory_space<vmem>>, %arg1: memref<120x64xf32, #tpu.memory_space<vmem>>, %arg2: memref<2x2xf32, #tpu.memory_space<vmem>>) attributes {dimension_semantics = [], scalar_prefetch = 0 : i64, scratch_operands = 0 : i64, tpu.core_type = #tpu.core_type<tc>} {
    %c0 = arith.constant 0 : index
    %c0_0 = arith.constant 0 : index
    %0 = vector.load %arg1[%c0, %c0_0] : memref<120x64xf32, #tpu.memory_space<vmem>>, vector<4x64xf32>
    %c8 = arith.constant 8 : index
    %c0_1 = arith.constant 0 : index
    %1 = vector.load %arg1[%c8, %c0_1] : memref<120x64xf32, #tpu.memory_space<vmem>>, vector<1x64xf32>
    %c16 = arith.constant 16 : index
    %c0_2 = arith.constant 0 : index
    %2 = vector.load %arg1[%c16, %c0_2] : memref<120x64xf32, #tpu.memory_space<vmem>>, vector<16x64xf32>
    %c32 = arith.constant 32 : index
    %c0_3 = arith.constant 0 : index
    %3 = vector.load %arg1[%c32, %c0_3] : memref<120x64xf32, #tpu.memory_space<vmem>>, vector<16x64xf32>
    %c48 = arith.constant 48 : index
    %c0_4 = arith.constant 0 : index
    %4 = vector.load %arg1[%c48, %c0_4] : memref<120x64xf32, #tpu.memory_space<vmem>>, vector<16x64xf32>
    %c64 = arith.constant 64 : index
    %c0_5 = arith.constant 0 : index
    %5 = vector.load %arg1[%c64, %c0_5] : memref<120x64xf32, #tpu.memory_space<vmem>>, vector<16x64xf32>
    %c80 = arith.constant 80 : index
    %c0_6 = arith.constant 0 : index
    %6 = vector.load %arg1[%c80, %c0_6] : memref<120x64xf32, #tpu.memory_space<vmem>>, vector<16x64xf32>
    %c9 = arith.constant 9 : index
    %c0_7 = arith.constant 0 : index
    %7 = vector.load %arg1[%c9, %c0_7] : memref<120x64xf32, #tpu.memory_space<vmem>>, vector<1x64xf32>
    %c10 = arith.constant 10 : index
    %c0_8 = arith.constant 0 : index
    %8 = vector.load %arg1[%c10, %c0_8] : memref<120x64xf32, #tpu.memory_space<vmem>>, vector<1x64xf32>
    %c96 = arith.constant 96 : index
    %c0_9 = arith.constant 0 : index
    %9 = vector.load %arg1[%c96, %c0_9] : memref<120x64xf32, #tpu.memory_space<vmem>>, vector<16x64xf32>
    %c112 = arith.constant 112 : index
    %c0_10 = arith.constant 0 : index
    %10 = vector.load %arg1[%c112, %c0_10] : memref<120x64xf32, #tpu.memory_space<vmem>>, vector<1x64xf32>
    %c0_11 = arith.constant 0 : index
    %c0_12 = arith.constant 0 : index
    %11 = vector.load %arg0[%c0_11, %c0_12] : memref<16x4xf32, #tpu.memory_space<vmem>>, vector<16x4xf32>
    %cst = arith.constant dense<0.000000e+00> : vector<16x64xf32>
    %12 = tpu.matmul %11, %0, %cst {dimension_numbers = #tpu.dot_dimension_numbers<[1], [0], [0], [1], [0, 0, 1, 1], [], []>} : vector<16x4xf32>, vector<4x64xf32>, vector<16x64xf32> -> vector<16x64xf32>
    %13 = vector.broadcast %1 : vector<1x64xf32> to vector<16x64xf32>
    %14 = arith.addf %12, %13 : vector<16x64xf32>
    %cst_13 = arith.constant 0.000000e+00 : f32
    %15 = vector.broadcast %cst_13 : f32 to vector<2x16xf32>
    %cst_14 = arith.constant 0.000000e+00 : f32
    %16 = vector.broadcast %cst_14 : f32 to vector<2x16xf32>
    %cst_15 = arith.constant 0.000000e+00 : f32
    %17 = vector.broadcast %cst_15 : f32 to vector<2x16xf32>
    %18 = vector.extract_strided_slice %14 {offsets = [0, 0], sizes = [2, 64], strides = [1, 1]} : vector<16x64xf32> to vector<2x64xf32>
    %cst_16 = arith.constant dense<0.000000e+00> : vector<2x64xf32>
    %19 = tpu.matmul %15, %2, %cst_16 {dimension_numbers = #tpu.dot_dimension_numbers<[1], [0], [0], [1], [0, 0, 1, 1], [], []>} : vector<2x16xf32>, vector<16x64xf32>, vector<2x64xf32> -> vector<2x64xf32>
    %20 = arith.addf %18, %19 : vector<2x64xf32>
    %21 = vector.extract_strided_slice %20 {offsets = [0, 0], sizes = [2, 32], strides = [1, 1]} : vector<2x64xf32> to vector<2x32xf32>
    %22 = arith.negf %21 : vector<2x32xf32>
    %23 = math.exp %22 : vector<2x32xf32>
    %cst_17 = arith.constant 1.000000e+00 : f32
    %24 = vector.broadcast %cst_17 : f32 to vector<2x32xf32>
    %25 = arith.addf %24, %23 : vector<2x32xf32>
    %26 = arith.divf %24, %25 : vector<2x32xf32>
    %27 = vector.extract_strided_slice %26 {offsets = [0, 0], sizes = [2, 16], strides = [1, 1]} : vector<2x32xf32> to vector<2x16xf32>
    %28 = vector.extract_strided_slice %26 {offsets = [0, 16], sizes = [2, 16], strides = [1, 1]} : vector<2x32xf32> to vector<2x16xf32>
    %29 = vector.extract_strided_slice %20 {offsets = [0, 32], sizes = [2, 16], strides = [1, 1]} : vector<2x64xf32> to vector<2x16xf32>
    %30 = vector.extract_strided_slice %20 {offsets = [0, 48], sizes = [2, 16], strides = [1, 1]} : vector<2x64xf32> to vector<2x16xf32>
    %31 = arith.mulf %27, %30 : vector<2x16xf32>
    %32 = arith.addf %29, %31 : vector<2x16xf32>
    %33 = math.tanh %32 : vector<2x16xf32>
    %34 = arith.subf %15, %33 : vector<2x16xf32>
    %35 = arith.mulf %28, %34 : vector<2x16xf32>
    %36 = arith.addf %33, %35 : vector<2x16xf32>
    %37 = vector.extract_strided_slice %14 {offsets = [2, 0], sizes = [2, 64], strides = [1, 1]} : vector<16x64xf32> to vector<2x64xf32>
    %cst_18 = arith.constant dense<0.000000e+00> : vector<2x64xf32>
    %38 = tpu.matmul %36, %2, %cst_18 {dimension_numbers = #tpu.dot_dimension_numbers<[1], [0], [0], [1], [0, 0, 1, 1], [], []>} : vector<2x16xf32>, vector<16x64xf32>, vector<2x64xf32> -> vector<2x64xf32>
    %39 = arith.addf %37, %38 : vector<2x64xf32>
    %40 = vector.extract_strided_slice %39 {offsets = [0, 0], sizes = [2, 32], strides = [1, 1]} : vector<2x64xf32> to vector<2x32xf32>
    %41 = arith.negf %40 : vector<2x32xf32>
    %42 = math.exp %41 : vector<2x32xf32>
    %cst_19 = arith.constant 1.000000e+00 : f32
    %43 = vector.broadcast %cst_19 : f32 to vector<2x32xf32>
    %44 = arith.addf %43, %42 : vector<2x32xf32>
    %45 = arith.divf %43, %44 : vector<2x32xf32>
    %46 = vector.extract_strided_slice %45 {offsets = [0, 0], sizes = [2, 16], strides = [1, 1]} : vector<2x32xf32> to vector<2x16xf32>
    %47 = vector.extract_strided_slice %45 {offsets = [0, 16], sizes = [2, 16], strides = [1, 1]} : vector<2x32xf32> to vector<2x16xf32>
    %48 = vector.extract_strided_slice %39 {offsets = [0, 32], sizes = [2, 16], strides = [1, 1]} : vector<2x64xf32> to vector<2x16xf32>
    %49 = vector.extract_strided_slice %39 {offsets = [0, 48], sizes = [2, 16], strides = [1, 1]} : vector<2x64xf32> to vector<2x16xf32>
    %50 = arith.mulf %46, %49 : vector<2x16xf32>
    %51 = arith.addf %48, %50 : vector<2x16xf32>
    %52 = math.tanh %51 : vector<2x16xf32>
    %53 = arith.subf %36, %52 : vector<2x16xf32>
    %54 = arith.mulf %47, %53 : vector<2x16xf32>
    %55 = arith.addf %52, %54 : vector<2x16xf32>
    %cst_20 = arith.constant dense<0.000000e+00> : vector<2x64xf32>
    %56 = tpu.matmul %36, %5, %cst_20 {dimension_numbers = #tpu.dot_dimension_numbers<[1], [0], [0], [1], [0, 0, 1, 1], [], []>} : vector<2x16xf32>, vector<16x64xf32>, vector<2x64xf32> -> vector<2x64xf32>
    %cst_21 = arith.constant dense<0.000000e+00> : vector<2x64xf32>
    %57 = tpu.matmul %16, %3, %cst_21 {dimension_numbers = #tpu.dot_dimension_numbers<[1], [0], [0], [1], [0, 0, 1, 1], [], []>} : vector<2x16xf32>, vector<16x64xf32>, vector<2x64xf32> -> vector<2x64xf32>
    %58 = arith.addf %56, %57 : vector<2x64xf32>
    %59 = vector.broadcast %7 : vector<1x64xf32> to vector<2x64xf32>
    %60 = arith.addf %58, %59 : vector<2x64xf32>
    %61 = vector.extract_strided_slice %60 {offsets = [0, 0], sizes = [2, 32], strides = [1, 1]} : vector<2x64xf32> to vector<2x32xf32>
    %62 = arith.negf %61 : vector<2x32xf32>
    %63 = math.exp %62 : vector<2x32xf32>
    %cst_22 = arith.constant 1.000000e+00 : f32
    %64 = vector.broadcast %cst_22 : f32 to vector<2x32xf32>
    %65 = arith.addf %64, %63 : vector<2x32xf32>
    %66 = arith.divf %64, %65 : vector<2x32xf32>
    %67 = vector.extract_strided_slice %66 {offsets = [0, 0], sizes = [2, 16], strides = [1, 1]} : vector<2x32xf32> to vector<2x16xf32>
    %68 = vector.extract_strided_slice %66 {offsets = [0, 16], sizes = [2, 16], strides = [1, 1]} : vector<2x32xf32> to vector<2x16xf32>
    %69 = vector.extract_strided_slice %60 {offsets = [0, 32], sizes = [2, 16], strides = [1, 1]} : vector<2x64xf32> to vector<2x16xf32>
    %70 = vector.extract_strided_slice %60 {offsets = [0, 48], sizes = [2, 16], strides = [1, 1]} : vector<2x64xf32> to vector<2x16xf32>
    %71 = arith.mulf %67, %70 : vector<2x16xf32>
    %72 = arith.addf %69, %71 : vector<2x16xf32>
    %73 = math.tanh %72 : vector<2x16xf32>
    %74 = arith.subf %16, %73 : vector<2x16xf32>
    %75 = arith.mulf %68, %74 : vector<2x16xf32>
    %76 = arith.addf %73, %75 : vector<2x16xf32>
    %77 = vector.extract_strided_slice %14 {offsets = [4, 0], sizes = [2, 64], strides = [1, 1]} : vector<16x64xf32> to vector<2x64xf32>
    %cst_23 = arith.constant dense<0.000000e+00> : vector<2x64xf32>
    %78 = tpu.matmul %55, %2, %cst_23 {dimension_numbers = #tpu.dot_dimension_numbers<[1], [0], [0], [1], [0, 0, 1, 1], [], []>} : vector<2x16xf32>, vector<16x64xf32>, vector<2x64xf32> -> vector<2x64xf32>
    %79 = arith.addf %77, %78 : vector<2x64xf32>
    %80 = vector.extract_strided_slice %79 {offsets = [0, 0], sizes = [2, 32], strides = [1, 1]} : vector<2x64xf32> to vector<2x32xf32>
    %81 = arith.negf %80 : vector<2x32xf32>
    %82 = math.exp %81 : vector<2x32xf32>
    %cst_24 = arith.constant 1.000000e+00 : f32
    %83 = vector.broadcast %cst_24 : f32 to vector<2x32xf32>
    %84 = arith.addf %83, %82 : vector<2x32xf32>
    %85 = arith.divf %83, %84 : vector<2x32xf32>
    %86 = vector.extract_strided_slice %85 {offsets = [0, 0], sizes = [2, 16], strides = [1, 1]} : vector<2x32xf32> to vector<2x16xf32>
    %87 = vector.extract_strided_slice %85 {offsets = [0, 16], sizes = [2, 16], strides = [1, 1]} : vector<2x32xf32> to vector<2x16xf32>
    %88 = vector.extract_strided_slice %79 {offsets = [0, 32], sizes = [2, 16], strides = [1, 1]} : vector<2x64xf32> to vector<2x16xf32>
    %89 = vector.extract_strided_slice %79 {offsets = [0, 48], sizes = [2, 16], strides = [1, 1]} : vector<2x64xf32> to vector<2x16xf32>
    %90 = arith.mulf %86, %89 : vector<2x16xf32>
    %91 = arith.addf %88, %90 : vector<2x16xf32>
    %92 = math.tanh %91 : vector<2x16xf32>
    %93 = arith.subf %55, %92 : vector<2x16xf32>
    %94 = arith.mulf %87, %93 : vector<2x16xf32>
    %95 = arith.addf %92, %94 : vector<2x16xf32>
    %cst_25 = arith.constant dense<0.000000e+00> : vector<2x64xf32>
    %96 = tpu.matmul %55, %5, %cst_25 {dimension_numbers = #tpu.dot_dimension_numbers<[1], [0], [0], [1], [0, 0, 1, 1], [], []>} : vector<2x16xf32>, vector<16x64xf32>, vector<2x64xf32> -> vector<2x64xf32>
    %cst_26 = arith.constant dense<0.000000e+00> : vector<2x64xf32>
    %97 = tpu.matmul %76, %3, %cst_26 {dimension_numbers = #tpu.dot_dimension_numbers<[1], [0], [0], [1], [0, 0, 1, 1], [], []>} : vector<2x16xf32>, vector<16x64xf32>, vector<2x64xf32> -> vector<2x64xf32>
    %98 = arith.addf %96, %97 : vector<2x64xf32>
    %99 = vector.broadcast %7 : vector<1x64xf32> to vector<2x64xf32>
    %100 = arith.addf %98, %99 : vector<2x64xf32>
    %101 = vector.extract_strided_slice %100 {offsets = [0, 0], sizes = [2, 32], strides = [1, 1]} : vector<2x64xf32> to vector<2x32xf32>
    %102 = arith.negf %101 : vector<2x32xf32>
    %103 = math.exp %102 : vector<2x32xf32>
    %cst_27 = arith.constant 1.000000e+00 : f32
    %104 = vector.broadcast %cst_27 : f32 to vector<2x32xf32>
    %105 = arith.addf %104, %103 : vector<2x32xf32>
    %106 = arith.divf %104, %105 : vector<2x32xf32>
    %107 = vector.extract_strided_slice %106 {offsets = [0, 0], sizes = [2, 16], strides = [1, 1]} : vector<2x32xf32> to vector<2x16xf32>
    %108 = vector.extract_strided_slice %106 {offsets = [0, 16], sizes = [2, 16], strides = [1, 1]} : vector<2x32xf32> to vector<2x16xf32>
    %109 = vector.extract_strided_slice %100 {offsets = [0, 32], sizes = [2, 16], strides = [1, 1]} : vector<2x64xf32> to vector<2x16xf32>
    %110 = vector.extract_strided_slice %100 {offsets = [0, 48], sizes = [2, 16], strides = [1, 1]} : vector<2x64xf32> to vector<2x16xf32>
    %111 = arith.mulf %107, %110 : vector<2x16xf32>
    %112 = arith.addf %109, %111 : vector<2x16xf32>
    %113 = math.tanh %112 : vector<2x16xf32>
    %114 = arith.subf %76, %113 : vector<2x16xf32>
    %115 = arith.mulf %108, %114 : vector<2x16xf32>
    %116 = arith.addf %113, %115 : vector<2x16xf32>
    %cst_28 = arith.constant dense<0.000000e+00> : vector<2x64xf32>
    %117 = tpu.matmul %76, %6, %cst_28 {dimension_numbers = #tpu.dot_dimension_numbers<[1], [0], [0], [1], [0, 0, 1, 1], [], []>} : vector<2x16xf32>, vector<16x64xf32>, vector<2x64xf32> -> vector<2x64xf32>
    %cst_29 = arith.constant dense<0.000000e+00> : vector<2x64xf32>
    %118 = tpu.matmul %17, %4, %cst_29 {dimension_numbers = #tpu.dot_dimension_numbers<[1], [0], [0], [1], [0, 0, 1, 1], [], []>} : vector<2x16xf32>, vector<16x64xf32>, vector<2x64xf32> -> vector<2x64xf32>
    %119 = arith.addf %117, %118 : vector<2x64xf32>
    %120 = vector.broadcast %8 : vector<1x64xf32> to vector<2x64xf32>
    %121 = arith.addf %119, %120 : vector<2x64xf32>
    %122 = vector.extract_strided_slice %121 {offsets = [0, 0], sizes = [2, 32], strides = [1, 1]} : vector<2x64xf32> to vector<2x32xf32>
    %123 = arith.negf %122 : vector<2x32xf32>
    %124 = math.exp %123 : vector<2x32xf32>
    %cst_30 = arith.constant 1.000000e+00 : f32
    %125 = vector.broadcast %cst_30 : f32 to vector<2x32xf32>
    %126 = arith.addf %125, %124 : vector<2x32xf32>
    %127 = arith.divf %125, %126 : vector<2x32xf32>
    %128 = vector.extract_strided_slice %127 {offsets = [0, 0], sizes = [2, 16], strides = [1, 1]} : vector<2x32xf32> to vector<2x16xf32>
    %129 = vector.extract_strided_slice %127 {offsets = [0, 16], sizes = [2, 16], strides = [1, 1]} : vector<2x32xf32> to vector<2x16xf32>
    %130 = vector.extract_strided_slice %121 {offsets = [0, 32], sizes = [2, 16], strides = [1, 1]} : vector<2x64xf32> to vector<2x16xf32>
    %131 = vector.extract_strided_slice %121 {offsets = [0, 48], sizes = [2, 16], strides = [1, 1]} : vector<2x64xf32> to vector<2x16xf32>
    %132 = arith.mulf %128, %131 : vector<2x16xf32>
    %133 = arith.addf %130, %132 : vector<2x16xf32>
    %134 = math.tanh %133 : vector<2x16xf32>
    %135 = arith.subf %17, %134 : vector<2x16xf32>
    %136 = arith.mulf %129, %135 : vector<2x16xf32>
    %137 = arith.addf %134, %136 : vector<2x16xf32>
    %138 = vector.extract_strided_slice %14 {offsets = [6, 0], sizes = [2, 64], strides = [1, 1]} : vector<16x64xf32> to vector<2x64xf32>
    %cst_31 = arith.constant dense<0.000000e+00> : vector<2x64xf32>
    %139 = tpu.matmul %95, %2, %cst_31 {dimension_numbers = #tpu.dot_dimension_numbers<[1], [0], [0], [1], [0, 0, 1, 1], [], []>} : vector<2x16xf32>, vector<16x64xf32>, vector<2x64xf32> -> vector<2x64xf32>
    %140 = arith.addf %138, %139 : vector<2x64xf32>
    %141 = vector.extract_strided_slice %140 {offsets = [0, 0], sizes = [2, 32], strides = [1, 1]} : vector<2x64xf32> to vector<2x32xf32>
    %142 = arith.negf %141 : vector<2x32xf32>
    %143 = math.exp %142 : vector<2x32xf32>
    %cst_32 = arith.constant 1.000000e+00 : f32
    %144 = vector.broadcast %cst_32 : f32 to vector<2x32xf32>
    %145 = arith.addf %144, %143 : vector<2x32xf32>
    %146 = arith.divf %144, %145 : vector<2x32xf32>
    %147 = vector.extract_strided_slice %146 {offsets = [0, 0], sizes = [2, 16], strides = [1, 1]} : vector<2x32xf32> to vector<2x16xf32>
    %148 = vector.extract_strided_slice %146 {offsets = [0, 16], sizes = [2, 16], strides = [1, 1]} : vector<2x32xf32> to vector<2x16xf32>
    %149 = vector.extract_strided_slice %140 {offsets = [0, 32], sizes = [2, 16], strides = [1, 1]} : vector<2x64xf32> to vector<2x16xf32>
    %150 = vector.extract_strided_slice %140 {offsets = [0, 48], sizes = [2, 16], strides = [1, 1]} : vector<2x64xf32> to vector<2x16xf32>
    %151 = arith.mulf %147, %150 : vector<2x16xf32>
    %152 = arith.addf %149, %151 : vector<2x16xf32>
    %153 = math.tanh %152 : vector<2x16xf32>
    %154 = arith.subf %95, %153 : vector<2x16xf32>
    %155 = arith.mulf %148, %154 : vector<2x16xf32>
    %156 = arith.addf %153, %155 : vector<2x16xf32>
    %cst_33 = arith.constant dense<0.000000e+00> : vector<2x64xf32>
    %157 = tpu.matmul %95, %5, %cst_33 {dimension_numbers = #tpu.dot_dimension_numbers<[1], [0], [0], [1], [0, 0, 1, 1], [], []>} : vector<2x16xf32>, vector<16x64xf32>, vector<2x64xf32> -> vector<2x64xf32>
    %cst_34 = arith.constant dense<0.000000e+00> : vector<2x64xf32>
    %158 = tpu.matmul %116, %3, %cst_34 {dimension_numbers = #tpu.dot_dimension_numbers<[1], [0], [0], [1], [0, 0, 1, 1], [], []>} : vector<2x16xf32>, vector<16x64xf32>, vector<2x64xf32> -> vector<2x64xf32>
    %159 = arith.addf %157, %158 : vector<2x64xf32>
    %160 = vector.broadcast %7 : vector<1x64xf32> to vector<2x64xf32>
    %161 = arith.addf %159, %160 : vector<2x64xf32>
    %162 = vector.extract_strided_slice %161 {offsets = [0, 0], sizes = [2, 32], strides = [1, 1]} : vector<2x64xf32> to vector<2x32xf32>
    %163 = arith.negf %162 : vector<2x32xf32>
    %164 = math.exp %163 : vector<2x32xf32>
    %cst_35 = arith.constant 1.000000e+00 : f32
    %165 = vector.broadcast %cst_35 : f32 to vector<2x32xf32>
    %166 = arith.addf %165, %164 : vector<2x32xf32>
    %167 = arith.divf %165, %166 : vector<2x32xf32>
    %168 = vector.extract_strided_slice %167 {offsets = [0, 0], sizes = [2, 16], strides = [1, 1]} : vector<2x32xf32> to vector<2x16xf32>
    %169 = vector.extract_strided_slice %167 {offsets = [0, 16], sizes = [2, 16], strides = [1, 1]} : vector<2x32xf32> to vector<2x16xf32>
    %170 = vector.extract_strided_slice %161 {offsets = [0, 32], sizes = [2, 16], strides = [1, 1]} : vector<2x64xf32> to vector<2x16xf32>
    %171 = vector.extract_strided_slice %161 {offsets = [0, 48], sizes = [2, 16], strides = [1, 1]} : vector<2x64xf32> to vector<2x16xf32>
    %172 = arith.mulf %168, %171 : vector<2x16xf32>
    %173 = arith.addf %170, %172 : vector<2x16xf32>
    %174 = math.tanh %173 : vector<2x16xf32>
    %175 = arith.subf %116, %174 : vector<2x16xf32>
    %176 = arith.mulf %169, %175 : vector<2x16xf32>
    %177 = arith.addf %174, %176 : vector<2x16xf32>
    %cst_36 = arith.constant dense<0.000000e+00> : vector<2x64xf32>
    %178 = tpu.matmul %116, %6, %cst_36 {dimension_numbers = #tpu.dot_dimension_numbers<[1], [0], [0], [1], [0, 0, 1, 1], [], []>} : vector<2x16xf32>, vector<16x64xf32>, vector<2x64xf32> -> vector<2x64xf32>
    %cst_37 = arith.constant dense<0.000000e+00> : vector<2x64xf32>
    %179 = tpu.matmul %137, %4, %cst_37 {dimension_numbers = #tpu.dot_dimension_numbers<[1], [0], [0], [1], [0, 0, 1, 1], [], []>} : vector<2x16xf32>, vector<16x64xf32>, vector<2x64xf32> -> vector<2x64xf32>
    %180 = arith.addf %178, %179 : vector<2x64xf32>
    %181 = vector.broadcast %8 : vector<1x64xf32> to vector<2x64xf32>
    %182 = arith.addf %180, %181 : vector<2x64xf32>
    %183 = vector.extract_strided_slice %182 {offsets = [0, 0], sizes = [2, 32], strides = [1, 1]} : vector<2x64xf32> to vector<2x32xf32>
    %184 = arith.negf %183 : vector<2x32xf32>
    %185 = math.exp %184 : vector<2x32xf32>
    %cst_38 = arith.constant 1.000000e+00 : f32
    %186 = vector.broadcast %cst_38 : f32 to vector<2x32xf32>
    %187 = arith.addf %186, %185 : vector<2x32xf32>
    %188 = arith.divf %186, %187 : vector<2x32xf32>
    %189 = vector.extract_strided_slice %188 {offsets = [0, 0], sizes = [2, 16], strides = [1, 1]} : vector<2x32xf32> to vector<2x16xf32>
    %190 = vector.extract_strided_slice %188 {offsets = [0, 16], sizes = [2, 16], strides = [1, 1]} : vector<2x32xf32> to vector<2x16xf32>
    %191 = vector.extract_strided_slice %182 {offsets = [0, 32], sizes = [2, 16], strides = [1, 1]} : vector<2x64xf32> to vector<2x16xf32>
    %192 = vector.extract_strided_slice %182 {offsets = [0, 48], sizes = [2, 16], strides = [1, 1]} : vector<2x64xf32> to vector<2x16xf32>
    %193 = arith.mulf %189, %192 : vector<2x16xf32>
    %194 = arith.addf %191, %193 : vector<2x16xf32>
    %195 = math.tanh %194 : vector<2x16xf32>
    %196 = arith.subf %137, %195 : vector<2x16xf32>
    %197 = arith.mulf %190, %196 : vector<2x16xf32>
    %198 = arith.addf %195, %197 : vector<2x16xf32>
    %199 = vector.extract_strided_slice %14 {offsets = [8, 0], sizes = [2, 64], strides = [1, 1]} : vector<16x64xf32> to vector<2x64xf32>
    %cst_39 = arith.constant dense<0.000000e+00> : vector<2x64xf32>
    %200 = tpu.matmul %156, %2, %cst_39 {dimension_numbers = #tpu.dot_dimension_numbers<[1], [0], [0], [1], [0, 0, 1, 1], [], []>} : vector<2x16xf32>, vector<16x64xf32>, vector<2x64xf32> -> vector<2x64xf32>
    %201 = arith.addf %199, %200 : vector<2x64xf32>
    %202 = vector.extract_strided_slice %201 {offsets = [0, 0], sizes = [2, 32], strides = [1, 1]} : vector<2x64xf32> to vector<2x32xf32>
    %203 = arith.negf %202 : vector<2x32xf32>
    %204 = math.exp %203 : vector<2x32xf32>
    %cst_40 = arith.constant 1.000000e+00 : f32
    %205 = vector.broadcast %cst_40 : f32 to vector<2x32xf32>
    %206 = arith.addf %205, %204 : vector<2x32xf32>
    %207 = arith.divf %205, %206 : vector<2x32xf32>
    %208 = vector.extract_strided_slice %207 {offsets = [0, 0], sizes = [2, 16], strides = [1, 1]} : vector<2x32xf32> to vector<2x16xf32>
    %209 = vector.extract_strided_slice %207 {offsets = [0, 16], sizes = [2, 16], strides = [1, 1]} : vector<2x32xf32> to vector<2x16xf32>
    %210 = vector.extract_strided_slice %201 {offsets = [0, 32], sizes = [2, 16], strides = [1, 1]} : vector<2x64xf32> to vector<2x16xf32>
    %211 = vector.extract_strided_slice %201 {offsets = [0, 48], sizes = [2, 16], strides = [1, 1]} : vector<2x64xf32> to vector<2x16xf32>
    %212 = arith.mulf %208, %211 : vector<2x16xf32>
    %213 = arith.addf %210, %212 : vector<2x16xf32>
    %214 = math.tanh %213 : vector<2x16xf32>
    %215 = arith.subf %156, %214 : vector<2x16xf32>
    %216 = arith.mulf %209, %215 : vector<2x16xf32>
    %217 = arith.addf %214, %216 : vector<2x16xf32>
    %cst_41 = arith.constant dense<0.000000e+00> : vector<2x64xf32>
    %218 = tpu.matmul %156, %5, %cst_41 {dimension_numbers = #tpu.dot_dimension_numbers<[1], [0], [0], [1], [0, 0, 1, 1], [], []>} : vector<2x16xf32>, vector<16x64xf32>, vector<2x64xf32> -> vector<2x64xf32>
    %cst_42 = arith.constant dense<0.000000e+00> : vector<2x64xf32>
    %219 = tpu.matmul %177, %3, %cst_42 {dimension_numbers = #tpu.dot_dimension_numbers<[1], [0], [0], [1], [0, 0, 1, 1], [], []>} : vector<2x16xf32>, vector<16x64xf32>, vector<2x64xf32> -> vector<2x64xf32>
    %220 = arith.addf %218, %219 : vector<2x64xf32>
    %221 = vector.broadcast %7 : vector<1x64xf32> to vector<2x64xf32>
    %222 = arith.addf %220, %221 : vector<2x64xf32>
    %223 = vector.extract_strided_slice %222 {offsets = [0, 0], sizes = [2, 32], strides = [1, 1]} : vector<2x64xf32> to vector<2x32xf32>
    %224 = arith.negf %223 : vector<2x32xf32>
    %225 = math.exp %224 : vector<2x32xf32>
    %cst_43 = arith.constant 1.000000e+00 : f32
    %226 = vector.broadcast %cst_43 : f32 to vector<2x32xf32>
    %227 = arith.addf %226, %225 : vector<2x32xf32>
    %228 = arith.divf %226, %227 : vector<2x32xf32>
    %229 = vector.extract_strided_slice %228 {offsets = [0, 0], sizes = [2, 16], strides = [1, 1]} : vector<2x32xf32> to vector<2x16xf32>
    %230 = vector.extract_strided_slice %228 {offsets = [0, 16], sizes = [2, 16], strides = [1, 1]} : vector<2x32xf32> to vector<2x16xf32>
    %231 = vector.extract_strided_slice %222 {offsets = [0, 32], sizes = [2, 16], strides = [1, 1]} : vector<2x64xf32> to vector<2x16xf32>
    %232 = vector.extract_strided_slice %222 {offsets = [0, 48], sizes = [2, 16], strides = [1, 1]} : vector<2x64xf32> to vector<2x16xf32>
    %233 = arith.mulf %229, %232 : vector<2x16xf32>
    %234 = arith.addf %231, %233 : vector<2x16xf32>
    %235 = math.tanh %234 : vector<2x16xf32>
    %236 = arith.subf %177, %235 : vector<2x16xf32>
    %237 = arith.mulf %230, %236 : vector<2x16xf32>
    %238 = arith.addf %235, %237 : vector<2x16xf32>
    %cst_44 = arith.constant dense<0.000000e+00> : vector<2x64xf32>
    %239 = tpu.matmul %177, %6, %cst_44 {dimension_numbers = #tpu.dot_dimension_numbers<[1], [0], [0], [1], [0, 0, 1, 1], [], []>} : vector<2x16xf32>, vector<16x64xf32>, vector<2x64xf32> -> vector<2x64xf32>
    %cst_45 = arith.constant dense<0.000000e+00> : vector<2x64xf32>
    %240 = tpu.matmul %198, %4, %cst_45 {dimension_numbers = #tpu.dot_dimension_numbers<[1], [0], [0], [1], [0, 0, 1, 1], [], []>} : vector<2x16xf32>, vector<16x64xf32>, vector<2x64xf32> -> vector<2x64xf32>
    %241 = arith.addf %239, %240 : vector<2x64xf32>
    %242 = vector.broadcast %8 : vector<1x64xf32> to vector<2x64xf32>
    %243 = arith.addf %241, %242 : vector<2x64xf32>
    %244 = vector.extract_strided_slice %243 {offsets = [0, 0], sizes = [2, 32], strides = [1, 1]} : vector<2x64xf32> to vector<2x32xf32>
    %245 = arith.negf %244 : vector<2x32xf32>
    %246 = math.exp %245 : vector<2x32xf32>
    %cst_46 = arith.constant 1.000000e+00 : f32
    %247 = vector.broadcast %cst_46 : f32 to vector<2x32xf32>
    %248 = arith.addf %247, %246 : vector<2x32xf32>
    %249 = arith.divf %247, %248 : vector<2x32xf32>
    %250 = vector.extract_strided_slice %249 {offsets = [0, 0], sizes = [2, 16], strides = [1, 1]} : vector<2x32xf32> to vector<2x16xf32>
    %251 = vector.extract_strided_slice %249 {offsets = [0, 16], sizes = [2, 16], strides = [1, 1]} : vector<2x32xf32> to vector<2x16xf32>
    %252 = vector.extract_strided_slice %243 {offsets = [0, 32], sizes = [2, 16], strides = [1, 1]} : vector<2x64xf32> to vector<2x16xf32>
    %253 = vector.extract_strided_slice %243 {offsets = [0, 48], sizes = [2, 16], strides = [1, 1]} : vector<2x64xf32> to vector<2x16xf32>
    %254 = arith.mulf %250, %253 : vector<2x16xf32>
    %255 = arith.addf %252, %254 : vector<2x16xf32>
    %256 = math.tanh %255 : vector<2x16xf32>
    %257 = arith.subf %198, %256 : vector<2x16xf32>
    %258 = arith.mulf %251, %257 : vector<2x16xf32>
    %259 = arith.addf %256, %258 : vector<2x16xf32>
    %260 = vector.extract_strided_slice %14 {offsets = [10, 0], sizes = [2, 64], strides = [1, 1]} : vector<16x64xf32> to vector<2x64xf32>
    %cst_47 = arith.constant dense<0.000000e+00> : vector<2x64xf32>
    %261 = tpu.matmul %217, %2, %cst_47 {dimension_numbers = #tpu.dot_dimension_numbers<[1], [0], [0], [1], [0, 0, 1, 1], [], []>} : vector<2x16xf32>, vector<16x64xf32>, vector<2x64xf32> -> vector<2x64xf32>
    %262 = arith.addf %260, %261 : vector<2x64xf32>
    %263 = vector.extract_strided_slice %262 {offsets = [0, 0], sizes = [2, 32], strides = [1, 1]} : vector<2x64xf32> to vector<2x32xf32>
    %264 = arith.negf %263 : vector<2x32xf32>
    %265 = math.exp %264 : vector<2x32xf32>
    %cst_48 = arith.constant 1.000000e+00 : f32
    %266 = vector.broadcast %cst_48 : f32 to vector<2x32xf32>
    %267 = arith.addf %266, %265 : vector<2x32xf32>
    %268 = arith.divf %266, %267 : vector<2x32xf32>
    %269 = vector.extract_strided_slice %268 {offsets = [0, 0], sizes = [2, 16], strides = [1, 1]} : vector<2x32xf32> to vector<2x16xf32>
    %270 = vector.extract_strided_slice %268 {offsets = [0, 16], sizes = [2, 16], strides = [1, 1]} : vector<2x32xf32> to vector<2x16xf32>
    %271 = vector.extract_strided_slice %262 {offsets = [0, 32], sizes = [2, 16], strides = [1, 1]} : vector<2x64xf32> to vector<2x16xf32>
    %272 = vector.extract_strided_slice %262 {offsets = [0, 48], sizes = [2, 16], strides = [1, 1]} : vector<2x64xf32> to vector<2x16xf32>
    %273 = arith.mulf %269, %272 : vector<2x16xf32>
    %274 = arith.addf %271, %273 : vector<2x16xf32>
    %275 = math.tanh %274 : vector<2x16xf32>
    %276 = arith.subf %217, %275 : vector<2x16xf32>
    %277 = arith.mulf %270, %276 : vector<2x16xf32>
    %278 = arith.addf %275, %277 : vector<2x16xf32>
    %cst_49 = arith.constant dense<0.000000e+00> : vector<2x64xf32>
    %279 = tpu.matmul %217, %5, %cst_49 {dimension_numbers = #tpu.dot_dimension_numbers<[1], [0], [0], [1], [0, 0, 1, 1], [], []>} : vector<2x16xf32>, vector<16x64xf32>, vector<2x64xf32> -> vector<2x64xf32>
    %cst_50 = arith.constant dense<0.000000e+00> : vector<2x64xf32>
    %280 = tpu.matmul %238, %3, %cst_50 {dimension_numbers = #tpu.dot_dimension_numbers<[1], [0], [0], [1], [0, 0, 1, 1], [], []>} : vector<2x16xf32>, vector<16x64xf32>, vector<2x64xf32> -> vector<2x64xf32>
    %281 = arith.addf %279, %280 : vector<2x64xf32>
    %282 = vector.broadcast %7 : vector<1x64xf32> to vector<2x64xf32>
    %283 = arith.addf %281, %282 : vector<2x64xf32>
    %284 = vector.extract_strided_slice %283 {offsets = [0, 0], sizes = [2, 32], strides = [1, 1]} : vector<2x64xf32> to vector<2x32xf32>
    %285 = arith.negf %284 : vector<2x32xf32>
    %286 = math.exp %285 : vector<2x32xf32>
    %cst_51 = arith.constant 1.000000e+00 : f32
    %287 = vector.broadcast %cst_51 : f32 to vector<2x32xf32>
    %288 = arith.addf %287, %286 : vector<2x32xf32>
    %289 = arith.divf %287, %288 : vector<2x32xf32>
    %290 = vector.extract_strided_slice %289 {offsets = [0, 0], sizes = [2, 16], strides = [1, 1]} : vector<2x32xf32> to vector<2x16xf32>
    %291 = vector.extract_strided_slice %289 {offsets = [0, 16], sizes = [2, 16], strides = [1, 1]} : vector<2x32xf32> to vector<2x16xf32>
    %292 = vector.extract_strided_slice %283 {offsets = [0, 32], sizes = [2, 16], strides = [1, 1]} : vector<2x64xf32> to vector<2x16xf32>
    %293 = vector.extract_strided_slice %283 {offsets = [0, 48], sizes = [2, 16], strides = [1, 1]} : vector<2x64xf32> to vector<2x16xf32>
    %294 = arith.mulf %290, %293 : vector<2x16xf32>
    %295 = arith.addf %292, %294 : vector<2x16xf32>
    %296 = math.tanh %295 : vector<2x16xf32>
    %297 = arith.subf %238, %296 : vector<2x16xf32>
    %298 = arith.mulf %291, %297 : vector<2x16xf32>
    %299 = arith.addf %296, %298 : vector<2x16xf32>
    %cst_52 = arith.constant dense<0.000000e+00> : vector<2x64xf32>
    %300 = tpu.matmul %238, %6, %cst_52 {dimension_numbers = #tpu.dot_dimension_numbers<[1], [0], [0], [1], [0, 0, 1, 1], [], []>} : vector<2x16xf32>, vector<16x64xf32>, vector<2x64xf32> -> vector<2x64xf32>
    %cst_53 = arith.constant dense<0.000000e+00> : vector<2x64xf32>
    %301 = tpu.matmul %259, %4, %cst_53 {dimension_numbers = #tpu.dot_dimension_numbers<[1], [0], [0], [1], [0, 0, 1, 1], [], []>} : vector<2x16xf32>, vector<16x64xf32>, vector<2x64xf32> -> vector<2x64xf32>
    %302 = arith.addf %300, %301 : vector<2x64xf32>
    %303 = vector.broadcast %8 : vector<1x64xf32> to vector<2x64xf32>
    %304 = arith.addf %302, %303 : vector<2x64xf32>
    %305 = vector.extract_strided_slice %304 {offsets = [0, 0], sizes = [2, 32], strides = [1, 1]} : vector<2x64xf32> to vector<2x32xf32>
    %306 = arith.negf %305 : vector<2x32xf32>
    %307 = math.exp %306 : vector<2x32xf32>
    %cst_54 = arith.constant 1.000000e+00 : f32
    %308 = vector.broadcast %cst_54 : f32 to vector<2x32xf32>
    %309 = arith.addf %308, %307 : vector<2x32xf32>
    %310 = arith.divf %308, %309 : vector<2x32xf32>
    %311 = vector.extract_strided_slice %310 {offsets = [0, 0], sizes = [2, 16], strides = [1, 1]} : vector<2x32xf32> to vector<2x16xf32>
    %312 = vector.extract_strided_slice %310 {offsets = [0, 16], sizes = [2, 16], strides = [1, 1]} : vector<2x32xf32> to vector<2x16xf32>
    %313 = vector.extract_strided_slice %304 {offsets = [0, 32], sizes = [2, 16], strides = [1, 1]} : vector<2x64xf32> to vector<2x16xf32>
    %314 = vector.extract_strided_slice %304 {offsets = [0, 48], sizes = [2, 16], strides = [1, 1]} : vector<2x64xf32> to vector<2x16xf32>
    %315 = arith.mulf %311, %314 : vector<2x16xf32>
    %316 = arith.addf %313, %315 : vector<2x16xf32>
    %317 = math.tanh %316 : vector<2x16xf32>
    %318 = arith.subf %259, %317 : vector<2x16xf32>
    %319 = arith.mulf %312, %318 : vector<2x16xf32>
    %320 = arith.addf %317, %319 : vector<2x16xf32>
    %321 = vector.extract_strided_slice %14 {offsets = [12, 0], sizes = [2, 64], strides = [1, 1]} : vector<16x64xf32> to vector<2x64xf32>
    %cst_55 = arith.constant dense<0.000000e+00> : vector<2x64xf32>
    %322 = tpu.matmul %278, %2, %cst_55 {dimension_numbers = #tpu.dot_dimension_numbers<[1], [0], [0], [1], [0, 0, 1, 1], [], []>} : vector<2x16xf32>, vector<16x64xf32>, vector<2x64xf32> -> vector<2x64xf32>
    %323 = arith.addf %321, %322 : vector<2x64xf32>
    %324 = vector.extract_strided_slice %323 {offsets = [0, 0], sizes = [2, 32], strides = [1, 1]} : vector<2x64xf32> to vector<2x32xf32>
    %325 = arith.negf %324 : vector<2x32xf32>
    %326 = math.exp %325 : vector<2x32xf32>
    %cst_56 = arith.constant 1.000000e+00 : f32
    %327 = vector.broadcast %cst_56 : f32 to vector<2x32xf32>
    %328 = arith.addf %327, %326 : vector<2x32xf32>
    %329 = arith.divf %327, %328 : vector<2x32xf32>
    %330 = vector.extract_strided_slice %329 {offsets = [0, 0], sizes = [2, 16], strides = [1, 1]} : vector<2x32xf32> to vector<2x16xf32>
    %331 = vector.extract_strided_slice %329 {offsets = [0, 16], sizes = [2, 16], strides = [1, 1]} : vector<2x32xf32> to vector<2x16xf32>
    %332 = vector.extract_strided_slice %323 {offsets = [0, 32], sizes = [2, 16], strides = [1, 1]} : vector<2x64xf32> to vector<2x16xf32>
    %333 = vector.extract_strided_slice %323 {offsets = [0, 48], sizes = [2, 16], strides = [1, 1]} : vector<2x64xf32> to vector<2x16xf32>
    %334 = arith.mulf %330, %333 : vector<2x16xf32>
    %335 = arith.addf %332, %334 : vector<2x16xf32>
    %336 = math.tanh %335 : vector<2x16xf32>
    %337 = arith.subf %278, %336 : vector<2x16xf32>
    %338 = arith.mulf %331, %337 : vector<2x16xf32>
    %339 = arith.addf %336, %338 : vector<2x16xf32>
    %cst_57 = arith.constant dense<0.000000e+00> : vector<2x64xf32>
    %340 = tpu.matmul %278, %5, %cst_57 {dimension_numbers = #tpu.dot_dimension_numbers<[1], [0], [0], [1], [0, 0, 1, 1], [], []>} : vector<2x16xf32>, vector<16x64xf32>, vector<2x64xf32> -> vector<2x64xf32>
    %cst_58 = arith.constant dense<0.000000e+00> : vector<2x64xf32>
    %341 = tpu.matmul %299, %3, %cst_58 {dimension_numbers = #tpu.dot_dimension_numbers<[1], [0], [0], [1], [0, 0, 1, 1], [], []>} : vector<2x16xf32>, vector<16x64xf32>, vector<2x64xf32> -> vector<2x64xf32>
    %342 = arith.addf %340, %341 : vector<2x64xf32>
    %343 = vector.broadcast %7 : vector<1x64xf32> to vector<2x64xf32>
    %344 = arith.addf %342, %343 : vector<2x64xf32>
    %345 = vector.extract_strided_slice %344 {offsets = [0, 0], sizes = [2, 32], strides = [1, 1]} : vector<2x64xf32> to vector<2x32xf32>
    %346 = arith.negf %345 : vector<2x32xf32>
    %347 = math.exp %346 : vector<2x32xf32>
    %cst_59 = arith.constant 1.000000e+00 : f32
    %348 = vector.broadcast %cst_59 : f32 to vector<2x32xf32>
    %349 = arith.addf %348, %347 : vector<2x32xf32>
    %350 = arith.divf %348, %349 : vector<2x32xf32>
    %351 = vector.extract_strided_slice %350 {offsets = [0, 0], sizes = [2, 16], strides = [1, 1]} : vector<2x32xf32> to vector<2x16xf32>
    %352 = vector.extract_strided_slice %350 {offsets = [0, 16], sizes = [2, 16], strides = [1, 1]} : vector<2x32xf32> to vector<2x16xf32>
    %353 = vector.extract_strided_slice %344 {offsets = [0, 32], sizes = [2, 16], strides = [1, 1]} : vector<2x64xf32> to vector<2x16xf32>
    %354 = vector.extract_strided_slice %344 {offsets = [0, 48], sizes = [2, 16], strides = [1, 1]} : vector<2x64xf32> to vector<2x16xf32>
    %355 = arith.mulf %351, %354 : vector<2x16xf32>
    %356 = arith.addf %353, %355 : vector<2x16xf32>
    %357 = math.tanh %356 : vector<2x16xf32>
    %358 = arith.subf %299, %357 : vector<2x16xf32>
    %359 = arith.mulf %352, %358 : vector<2x16xf32>
    %360 = arith.addf %357, %359 : vector<2x16xf32>
    %cst_60 = arith.constant dense<0.000000e+00> : vector<2x64xf32>
    %361 = tpu.matmul %299, %6, %cst_60 {dimension_numbers = #tpu.dot_dimension_numbers<[1], [0], [0], [1], [0, 0, 1, 1], [], []>} : vector<2x16xf32>, vector<16x64xf32>, vector<2x64xf32> -> vector<2x64xf32>
    %cst_61 = arith.constant dense<0.000000e+00> : vector<2x64xf32>
    %362 = tpu.matmul %320, %4, %cst_61 {dimension_numbers = #tpu.dot_dimension_numbers<[1], [0], [0], [1], [0, 0, 1, 1], [], []>} : vector<2x16xf32>, vector<16x64xf32>, vector<2x64xf32> -> vector<2x64xf32>
    %363 = arith.addf %361, %362 : vector<2x64xf32>
    %364 = vector.broadcast %8 : vector<1x64xf32> to vector<2x64xf32>
    %365 = arith.addf %363, %364 : vector<2x64xf32>
    %366 = vector.extract_strided_slice %365 {offsets = [0, 0], sizes = [2, 32], strides = [1, 1]} : vector<2x64xf32> to vector<2x32xf32>
    %367 = arith.negf %366 : vector<2x32xf32>
    %368 = math.exp %367 : vector<2x32xf32>
    %cst_62 = arith.constant 1.000000e+00 : f32
    %369 = vector.broadcast %cst_62 : f32 to vector<2x32xf32>
    %370 = arith.addf %369, %368 : vector<2x32xf32>
    %371 = arith.divf %369, %370 : vector<2x32xf32>
    %372 = vector.extract_strided_slice %371 {offsets = [0, 0], sizes = [2, 16], strides = [1, 1]} : vector<2x32xf32> to vector<2x16xf32>
    %373 = vector.extract_strided_slice %371 {offsets = [0, 16], sizes = [2, 16], strides = [1, 1]} : vector<2x32xf32> to vector<2x16xf32>
    %374 = vector.extract_strided_slice %365 {offsets = [0, 32], sizes = [2, 16], strides = [1, 1]} : vector<2x64xf32> to vector<2x16xf32>
    %375 = vector.extract_strided_slice %365 {offsets = [0, 48], sizes = [2, 16], strides = [1, 1]} : vector<2x64xf32> to vector<2x16xf32>
    %376 = arith.mulf %372, %375 : vector<2x16xf32>
    %377 = arith.addf %374, %376 : vector<2x16xf32>
    %378 = math.tanh %377 : vector<2x16xf32>
    %379 = arith.subf %320, %378 : vector<2x16xf32>
    %380 = arith.mulf %373, %379 : vector<2x16xf32>
    %381 = arith.addf %378, %380 : vector<2x16xf32>
    %382 = vector.extract_strided_slice %14 {offsets = [14, 0], sizes = [2, 64], strides = [1, 1]} : vector<16x64xf32> to vector<2x64xf32>
    %cst_63 = arith.constant dense<0.000000e+00> : vector<2x64xf32>
    %383 = tpu.matmul %339, %2, %cst_63 {dimension_numbers = #tpu.dot_dimension_numbers<[1], [0], [0], [1], [0, 0, 1, 1], [], []>} : vector<2x16xf32>, vector<16x64xf32>, vector<2x64xf32> -> vector<2x64xf32>
    %384 = arith.addf %382, %383 : vector<2x64xf32>
    %385 = vector.extract_strided_slice %384 {offsets = [0, 0], sizes = [2, 32], strides = [1, 1]} : vector<2x64xf32> to vector<2x32xf32>
    %386 = arith.negf %385 : vector<2x32xf32>
    %387 = math.exp %386 : vector<2x32xf32>
    %cst_64 = arith.constant 1.000000e+00 : f32
    %388 = vector.broadcast %cst_64 : f32 to vector<2x32xf32>
    %389 = arith.addf %388, %387 : vector<2x32xf32>
    %390 = arith.divf %388, %389 : vector<2x32xf32>
    %391 = vector.extract_strided_slice %390 {offsets = [0, 0], sizes = [2, 16], strides = [1, 1]} : vector<2x32xf32> to vector<2x16xf32>
    %392 = vector.extract_strided_slice %390 {offsets = [0, 16], sizes = [2, 16], strides = [1, 1]} : vector<2x32xf32> to vector<2x16xf32>
    %393 = vector.extract_strided_slice %384 {offsets = [0, 32], sizes = [2, 16], strides = [1, 1]} : vector<2x64xf32> to vector<2x16xf32>
    %394 = vector.extract_strided_slice %384 {offsets = [0, 48], sizes = [2, 16], strides = [1, 1]} : vector<2x64xf32> to vector<2x16xf32>
    %395 = arith.mulf %391, %394 : vector<2x16xf32>
    %396 = arith.addf %393, %395 : vector<2x16xf32>
    %397 = math.tanh %396 : vector<2x16xf32>
    %398 = arith.subf %339, %397 : vector<2x16xf32>
    %399 = arith.mulf %392, %398 : vector<2x16xf32>
    %400 = arith.addf %397, %399 : vector<2x16xf32>
    %cst_65 = arith.constant dense<0.000000e+00> : vector<2x64xf32>
    %401 = tpu.matmul %339, %5, %cst_65 {dimension_numbers = #tpu.dot_dimension_numbers<[1], [0], [0], [1], [0, 0, 1, 1], [], []>} : vector<2x16xf32>, vector<16x64xf32>, vector<2x64xf32> -> vector<2x64xf32>
    %cst_66 = arith.constant dense<0.000000e+00> : vector<2x64xf32>
    %402 = tpu.matmul %360, %3, %cst_66 {dimension_numbers = #tpu.dot_dimension_numbers<[1], [0], [0], [1], [0, 0, 1, 1], [], []>} : vector<2x16xf32>, vector<16x64xf32>, vector<2x64xf32> -> vector<2x64xf32>
    %403 = arith.addf %401, %402 : vector<2x64xf32>
    %404 = vector.broadcast %7 : vector<1x64xf32> to vector<2x64xf32>
    %405 = arith.addf %403, %404 : vector<2x64xf32>
    %406 = vector.extract_strided_slice %405 {offsets = [0, 0], sizes = [2, 32], strides = [1, 1]} : vector<2x64xf32> to vector<2x32xf32>
    %407 = arith.negf %406 : vector<2x32xf32>
    %408 = math.exp %407 : vector<2x32xf32>
    %cst_67 = arith.constant 1.000000e+00 : f32
    %409 = vector.broadcast %cst_67 : f32 to vector<2x32xf32>
    %410 = arith.addf %409, %408 : vector<2x32xf32>
    %411 = arith.divf %409, %410 : vector<2x32xf32>
    %412 = vector.extract_strided_slice %411 {offsets = [0, 0], sizes = [2, 16], strides = [1, 1]} : vector<2x32xf32> to vector<2x16xf32>
    %413 = vector.extract_strided_slice %411 {offsets = [0, 16], sizes = [2, 16], strides = [1, 1]} : vector<2x32xf32> to vector<2x16xf32>
    %414 = vector.extract_strided_slice %405 {offsets = [0, 32], sizes = [2, 16], strides = [1, 1]} : vector<2x64xf32> to vector<2x16xf32>
    %415 = vector.extract_strided_slice %405 {offsets = [0, 48], sizes = [2, 16], strides = [1, 1]} : vector<2x64xf32> to vector<2x16xf32>
    %416 = arith.mulf %412, %415 : vector<2x16xf32>
    %417 = arith.addf %414, %416 : vector<2x16xf32>
    %418 = math.tanh %417 : vector<2x16xf32>
    %419 = arith.subf %360, %418 : vector<2x16xf32>
    %420 = arith.mulf %413, %419 : vector<2x16xf32>
    %421 = arith.addf %418, %420 : vector<2x16xf32>
    %cst_68 = arith.constant dense<0.000000e+00> : vector<2x64xf32>
    %422 = tpu.matmul %360, %6, %cst_68 {dimension_numbers = #tpu.dot_dimension_numbers<[1], [0], [0], [1], [0, 0, 1, 1], [], []>} : vector<2x16xf32>, vector<16x64xf32>, vector<2x64xf32> -> vector<2x64xf32>
    %cst_69 = arith.constant dense<0.000000e+00> : vector<2x64xf32>
    %423 = tpu.matmul %381, %4, %cst_69 {dimension_numbers = #tpu.dot_dimension_numbers<[1], [0], [0], [1], [0, 0, 1, 1], [], []>} : vector<2x16xf32>, vector<16x64xf32>, vector<2x64xf32> -> vector<2x64xf32>
    %424 = arith.addf %422, %423 : vector<2x64xf32>
    %425 = vector.broadcast %8 : vector<1x64xf32> to vector<2x64xf32>
    %426 = arith.addf %424, %425 : vector<2x64xf32>
    %427 = vector.extract_strided_slice %426 {offsets = [0, 0], sizes = [2, 32], strides = [1, 1]} : vector<2x64xf32> to vector<2x32xf32>
    %428 = arith.negf %427 : vector<2x32xf32>
    %429 = math.exp %428 : vector<2x32xf32>
    %cst_70 = arith.constant 1.000000e+00 : f32
    %430 = vector.broadcast %cst_70 : f32 to vector<2x32xf32>
    %431 = arith.addf %430, %429 : vector<2x32xf32>
    %432 = arith.divf %430, %431 : vector<2x32xf32>
    %433 = vector.extract_strided_slice %432 {offsets = [0, 0], sizes = [2, 16], strides = [1, 1]} : vector<2x32xf32> to vector<2x16xf32>
    %434 = vector.extract_strided_slice %432 {offsets = [0, 16], sizes = [2, 16], strides = [1, 1]} : vector<2x32xf32> to vector<2x16xf32>
    %435 = vector.extract_strided_slice %426 {offsets = [0, 32], sizes = [2, 16], strides = [1, 1]} : vector<2x64xf32> to vector<2x16xf32>
    %436 = vector.extract_strided_slice %426 {offsets = [0, 48], sizes = [2, 16], strides = [1, 1]} : vector<2x64xf32> to vector<2x16xf32>
    %437 = arith.mulf %433, %436 : vector<2x16xf32>
    %438 = arith.addf %435, %437 : vector<2x16xf32>
    %439 = math.tanh %438 : vector<2x16xf32>
    %440 = arith.subf %381, %439 : vector<2x16xf32>
    %441 = arith.mulf %434, %440 : vector<2x16xf32>
    %442 = arith.addf %439, %441 : vector<2x16xf32>
    %cst_71 = arith.constant dense<0.000000e+00> : vector<2x64xf32>
    %443 = tpu.matmul %400, %5, %cst_71 {dimension_numbers = #tpu.dot_dimension_numbers<[1], [0], [0], [1], [0, 0, 1, 1], [], []>} : vector<2x16xf32>, vector<16x64xf32>, vector<2x64xf32> -> vector<2x64xf32>
    %cst_72 = arith.constant dense<0.000000e+00> : vector<2x64xf32>
    %444 = tpu.matmul %421, %3, %cst_72 {dimension_numbers = #tpu.dot_dimension_numbers<[1], [0], [0], [1], [0, 0, 1, 1], [], []>} : vector<2x16xf32>, vector<16x64xf32>, vector<2x64xf32> -> vector<2x64xf32>
    %445 = arith.addf %443, %444 : vector<2x64xf32>
    %446 = vector.broadcast %7 : vector<1x64xf32> to vector<2x64xf32>
    %447 = arith.addf %445, %446 : vector<2x64xf32>
    %448 = vector.extract_strided_slice %447 {offsets = [0, 0], sizes = [2, 32], strides = [1, 1]} : vector<2x64xf32> to vector<2x32xf32>
    %449 = arith.negf %448 : vector<2x32xf32>
    %450 = math.exp %449 : vector<2x32xf32>
    %cst_73 = arith.constant 1.000000e+00 : f32
    %451 = vector.broadcast %cst_73 : f32 to vector<2x32xf32>
    %452 = arith.addf %451, %450 : vector<2x32xf32>
    %453 = arith.divf %451, %452 : vector<2x32xf32>
    %454 = vector.extract_strided_slice %453 {offsets = [0, 0], sizes = [2, 16], strides = [1, 1]} : vector<2x32xf32> to vector<2x16xf32>
    %455 = vector.extract_strided_slice %453 {offsets = [0, 16], sizes = [2, 16], strides = [1, 1]} : vector<2x32xf32> to vector<2x16xf32>
    %456 = vector.extract_strided_slice %447 {offsets = [0, 32], sizes = [2, 16], strides = [1, 1]} : vector<2x64xf32> to vector<2x16xf32>
    %457 = vector.extract_strided_slice %447 {offsets = [0, 48], sizes = [2, 16], strides = [1, 1]} : vector<2x64xf32> to vector<2x16xf32>
    %458 = arith.mulf %454, %457 : vector<2x16xf32>
    %459 = arith.addf %456, %458 : vector<2x16xf32>
    %460 = math.tanh %459 : vector<2x16xf32>
    %461 = arith.subf %421, %460 : vector<2x16xf32>
    %462 = arith.mulf %455, %461 : vector<2x16xf32>
    %463 = arith.addf %460, %462 : vector<2x16xf32>
    %cst_74 = arith.constant dense<0.000000e+00> : vector<2x64xf32>
    %464 = tpu.matmul %421, %6, %cst_74 {dimension_numbers = #tpu.dot_dimension_numbers<[1], [0], [0], [1], [0, 0, 1, 1], [], []>} : vector<2x16xf32>, vector<16x64xf32>, vector<2x64xf32> -> vector<2x64xf32>
    %cst_75 = arith.constant dense<0.000000e+00> : vector<2x64xf32>
    %465 = tpu.matmul %442, %4, %cst_75 {dimension_numbers = #tpu.dot_dimension_numbers<[1], [0], [0], [1], [0, 0, 1, 1], [], []>} : vector<2x16xf32>, vector<16x64xf32>, vector<2x64xf32> -> vector<2x64xf32>
    %466 = arith.addf %464, %465 : vector<2x64xf32>
    %467 = vector.broadcast %8 : vector<1x64xf32> to vector<2x64xf32>
    %468 = arith.addf %466, %467 : vector<2x64xf32>
    %469 = vector.extract_strided_slice %468 {offsets = [0, 0], sizes = [2, 32], strides = [1, 1]} : vector<2x64xf32> to vector<2x32xf32>
    %470 = arith.negf %469 : vector<2x32xf32>
    %471 = math.exp %470 : vector<2x32xf32>
    %cst_76 = arith.constant 1.000000e+00 : f32
    %472 = vector.broadcast %cst_76 : f32 to vector<2x32xf32>
    %473 = arith.addf %472, %471 : vector<2x32xf32>
    %474 = arith.divf %472, %473 : vector<2x32xf32>
    %475 = vector.extract_strided_slice %474 {offsets = [0, 0], sizes = [2, 16], strides = [1, 1]} : vector<2x32xf32> to vector<2x16xf32>
    %476 = vector.extract_strided_slice %474 {offsets = [0, 16], sizes = [2, 16], strides = [1, 1]} : vector<2x32xf32> to vector<2x16xf32>
    %477 = vector.extract_strided_slice %468 {offsets = [0, 32], sizes = [2, 16], strides = [1, 1]} : vector<2x64xf32> to vector<2x16xf32>
    %478 = vector.extract_strided_slice %468 {offsets = [0, 48], sizes = [2, 16], strides = [1, 1]} : vector<2x64xf32> to vector<2x16xf32>
    %479 = arith.mulf %475, %478 : vector<2x16xf32>
    %480 = arith.addf %477, %479 : vector<2x16xf32>
    %481 = math.tanh %480 : vector<2x16xf32>
    %482 = arith.subf %442, %481 : vector<2x16xf32>
    %483 = arith.mulf %476, %482 : vector<2x16xf32>
    %484 = arith.addf %481, %483 : vector<2x16xf32>
    %cst_77 = arith.constant dense<0.000000e+00> : vector<2x64xf32>
    %485 = tpu.matmul %463, %6, %cst_77 {dimension_numbers = #tpu.dot_dimension_numbers<[1], [0], [0], [1], [0, 0, 1, 1], [], []>} : vector<2x16xf32>, vector<16x64xf32>, vector<2x64xf32> -> vector<2x64xf32>
    %cst_78 = arith.constant dense<0.000000e+00> : vector<2x64xf32>
    %486 = tpu.matmul %484, %4, %cst_78 {dimension_numbers = #tpu.dot_dimension_numbers<[1], [0], [0], [1], [0, 0, 1, 1], [], []>} : vector<2x16xf32>, vector<16x64xf32>, vector<2x64xf32> -> vector<2x64xf32>
    %487 = arith.addf %485, %486 : vector<2x64xf32>
    %488 = vector.broadcast %8 : vector<1x64xf32> to vector<2x64xf32>
    %489 = arith.addf %487, %488 : vector<2x64xf32>
    %490 = vector.extract_strided_slice %489 {offsets = [0, 0], sizes = [2, 32], strides = [1, 1]} : vector<2x64xf32> to vector<2x32xf32>
    %491 = arith.negf %490 : vector<2x32xf32>
    %492 = math.exp %491 : vector<2x32xf32>
    %cst_79 = arith.constant 1.000000e+00 : f32
    %493 = vector.broadcast %cst_79 : f32 to vector<2x32xf32>
    %494 = arith.addf %493, %492 : vector<2x32xf32>
    %495 = arith.divf %493, %494 : vector<2x32xf32>
    %496 = vector.extract_strided_slice %495 {offsets = [0, 0], sizes = [2, 16], strides = [1, 1]} : vector<2x32xf32> to vector<2x16xf32>
    %497 = vector.extract_strided_slice %495 {offsets = [0, 16], sizes = [2, 16], strides = [1, 1]} : vector<2x32xf32> to vector<2x16xf32>
    %498 = vector.extract_strided_slice %489 {offsets = [0, 32], sizes = [2, 16], strides = [1, 1]} : vector<2x64xf32> to vector<2x16xf32>
    %499 = vector.extract_strided_slice %489 {offsets = [0, 48], sizes = [2, 16], strides = [1, 1]} : vector<2x64xf32> to vector<2x16xf32>
    %500 = arith.mulf %496, %499 : vector<2x16xf32>
    %501 = arith.addf %498, %500 : vector<2x16xf32>
    %502 = math.tanh %501 : vector<2x16xf32>
    %503 = arith.subf %484, %502 : vector<2x16xf32>
    %504 = arith.mulf %497, %503 : vector<2x16xf32>
    %505 = arith.addf %502, %504 : vector<2x16xf32>
    %cst_80 = arith.constant dense<0.000000e+00> : vector<2x64xf32>
    %506 = tpu.matmul %505, %9, %cst_80 {dimension_numbers = #tpu.dot_dimension_numbers<[1], [0], [0], [1], [0, 0, 1, 1], [], []>} : vector<2x16xf32>, vector<16x64xf32>, vector<2x64xf32> -> vector<2x64xf32>
    %507 = vector.broadcast %10 : vector<1x64xf32> to vector<2x64xf32>
    %508 = arith.addf %506, %507 : vector<2x64xf32>
    %509 = vector.extract_strided_slice %508 {offsets = [0, 0], sizes = [2, 2], strides = [1, 1]} : vector<2x64xf32> to vector<2x2xf32>
    %c0_81 = arith.constant 0 : index
    %c0_82 = arith.constant 0 : index
    %510 = vector.load %arg2[%c0_81, %c0_82] : memref<2x2xf32, #tpu.memory_space<vmem>>, vector<2x2xf32>
    tpu.vector_store %arg2[%c0_81, %c0_82], %509 {strides = array<i32>} : memref<2x2xf32, #tpu.memory_space<vmem>>, vector<2x2xf32>,
    return
  }
}

</mosaic_0001>

<bundles_post_ra>
// kernel: tpu_custom_call.1
= control target key start
LH: loop header
LB: loop body
LE: loop exit
PB: predicated region body
PF: predicated region fallthrough
CT: control target
= control target key end

     0   :  { %vm42_vm0 = vcmask 1043456   ;;  %vm35_vm1 = vcmask 31744   ;;  %v4564_v2 = vmov 0.0   ;;  %s5240_s0 = inlined_call_operand.vmem [shape: f32[16,4], index: 0, kind: input, shape index: {}]   ;;  %s5241_s1 = inlined_call_operand.vmem [shape: f32[120,64], index: 1, kind: input, shape index: {}]   ;;  %s5242_s2 = inlined_call_operand.hbm [shape: f32[2,2], index: 2, kind: output, shape index: {}]  }
   0x1   :  { %v12_v0 = vld [vmem:[%s5241_s1] sm:$0xf]  ;;  %4091 = vmatprep.subr.mxu1 %v4564_v2  ;;  %v4597_v3 = vld [vmem:[%s5241_s1 + $0x18] sm:$0xff]  ;;  %v30_v4 = vld [vmem:[%s5240_s0 + $0x8] sm:$0xff] }
   0x2   :  { %v29_v1 = vld [vmem:[%s5240_s0] sm:$0xff]  ;;  %4086 = vmatprep.subr.msk.mxu0 %vm42_vm0, %v12_v0  ;;  %v4605_v5 = vld [vmem:[%s5241_s1 + $0x10] sm:$0xff] }
   0x3   :  { %4087 = vmatpush3.msk.msra.mxu0 %vm42_vm0, %v12_v0  ;;  %4088 = vmatprep.mubr.msk.f32.mxu0 %vm35_vm1, %v29_v1 }
   0x4   :  { %7 = vsyncpa [#allocation3], 0  ;;  %4092 = vmatpush3.msra.mxu1 %v4597_v3  ;;  %4089 = vmatmul.mubr.msk.f32.vlgmr.msra.gmra.mxu0 %vm35_vm1, %v30_v4  ;;  %vm4565_vm2 = vmmov 0   ;;  %v3891_v6 = vld [vmem:[%s5241_s1 + $0x8] ss:$0 sm:$0xff]  ;;  %s4566_s20 = smov 80  }
   0x5   :  { %4093 = vmatprep.subr.mxu1 %v4564_v2  ;;  %4095 = vmatprep.mubr.msk.f32.mxu1 %vm4565_vm2, %v4564_v2  ;;  %s4567_s21 = smov 32   ;;  %s4568_s22 = smov 112   ;;  %v4638_v26 = vld [vmem:[%s5241_s1 + $0x28] sm:$0xff]  ;;  %v4645_v27 = vld [vmem:[%s5241_s1 + $0x20] sm:$0xff]  ;;  %vm121_vm3 = vcmask 130048   ;;  %vm3875_vm4 = vcmask 9216  }
   0x6   :  { %4094 = vmatpush3.msra.mxu1 %v4605_v5  ;;  %4098 = vmatprep.subr.mxu0 %v4564_v2  ;;  %s4569_s23 = smov 16   ;;  %s4570_s28 = smov 96   ;;  %v4660_v30 = vld [vmem:[%s5241_s1 + $0x48] sm:$0xff]  ;;  %v4666_v32 = vld [vmem:[%s5241_s1 + $0x40] sm:$0xff] }
   0x7   :  { %4096 = vmatmul.mubr.f32.vlgmr.msra.gmra.mxu1 %v4564_v2  ;;  %4099 = vmatpush3.msra.mxu0 %v4597_v3  ;;  %v4685_v39 = vld [vmem:[%s5241_s1 + $0x9] ss:$0 sm:$0xff]  ;;  %s4571_s19 = smov [#allocation2]  }
   0x8   :  { %4100 = vmatprep.subr.mxu0 %v4564_v2  ;;  %4102 = vmatprep.mubr.msk.f32.mxu0 %vm4565_vm2, %v4564_v2  ;;  %s3883_s24 = sshll.u32 %s4571_s19, 4  ;;  %s3884_s24 = int_to_ptr.vmem [resolvable:$true] %s3883_s24 }
   0x9   :  { %4101 = vmatpush3.msra.mxu0 %v4605_v5  ;;  %4105 = vmatprep.subr.mxu1 %v4564_v2  ;;  %p4547_p1 = scmp.lt.s32.totalorder %s3884_s24, %s3884_s24 }
   0xa   :  { %4112 = vmatprep.subr.mxu0 %v4564_v2  ;;  %4109 = vmatprep.mubr.msk.f32.mxu1 %vm4565_vm2, %v4564_v2 }
   0xb   :  { %4106 = vmatpush3.msra.mxu1 %v4638_v26 }
   0xc   :  { %4107 = vmatprep.subr.mxu1 %v4564_v2 }
   0xd   :  { %4108 = vmatpush3.msra.mxu1 %v4645_v27 }
   0xe   :  { %4110 = vmatmul.mubr.f32.vlgmr.msra.gmra.mxu1 %v4564_v2  ;;  %4119 = vmatprep.subr.mxu1 %v4564_v2 }
   0xf   :  { %4120 = vmatpush3.msra.mxu1 %v4597_v3  ;;  %4123 = vmatprep.mubr.msk.f32.mxu1 %vm4565_vm2, %v4564_v2 }
  0x10   :  { %4121 = vmatprep.subr.mxu1 %v4564_v2 }
  0x11   :  { %4122 = vmatpush3.msra.mxu1 %v4605_v5 }
  0x12   :  { %4133 = vmatprep.subr.mxu1 %v4564_v2 }
  0xc4   :  { %v4090_v7 = vpop.f32.mrf.mxu0 }
  0xc5   :  { %v4626_v8 = vadd.f32 %v4090_v7, %v3891_v6 }
  0xc6   :  { %v112_v9 = vpop.f32.mrf.mxu0 }
  0xc7   :  { %v4628_v10 = vadd.f32 %v3891_v6, %v112_v9  ;;  %v191_v11 = vpop.f32.mrf.mxu1 }
  0xc9   :  { %v195_v12 = vadd.f32 %v191_v11, %v4628_v10  ;;  %v4097_v13 = vpop.f32.mrf.mxu1 }
  0xcb   :  { %203 = vrot.lane.b32.xlu0 %v195_v12, %s4566_s20  ;;  %v3895_v14 = vmul.f32 -1.442695, %v195_v12 }
  0xcd   :  { %4386 = vpow2.f32 %v3895_v14 }
  0xce   :  { %v401_v33 = vpop.f32.mrf.mxu1 }
  0xd0   :  { %v4111_v34 = vpop.f32.mrf.mxu1 }
  0xda   :  { %v4387_v15 = vpop.eup %4386 }
  0xdb   :  { %v199_v16 = vadd.f32 1.0, %v4387_v15 }
  0xdd   :  { %4388 = vrcp.f32 %v199_v16  ;;  %v4707_v16 = vld [vmem:[%s5241_s1 + $0x38] sm:$0xff] }
  0xea   :  { %v4389_v17 = vpop.eup %4388 }
 0x13d   :  { %v204_v18 = vpop.permute.xlu0 %203 }
 0x13e   :  { %v206_v19 = vmul.f32 %v4389_v17, %v204_v18 }
 0x140   :  { %208 = vrot.lane.b32.xlu0 %v206_v19, %s4567_s21  ;;  %v4714_v19 = vld [vmem:[%s5241_s1 + $0x30] sm:$0xff] }
 0x1b2   :  { %v209_v20 = vpop.permute.xlu0 %208 }
 0x1b3   :  { %v211_v21 = vadd.f32 %v209_v20, %v195_v12  ;;  %v4727_v20 = vld [vmem:[%s5241_s1 + $0x58] sm:$0xff] }
 0x1b5   :  { %4390 = vtanh.f32 %v211_v21  ;;  %v4737_v21 = vld [vmem:[%s5241_s1 + $0x50] sm:$0xff] }
 0x1c2   :  { %v4391_v22 = vpop.eup %4390 }
 0x1c3   :  { %v213_v23 = vsub.f32 0.0, %v4391_v22 }
 0x1c5   :  { %215 = vrot.lane.b32.xlu1 %v213_v23, %s4568_s22 }
 0x237   :  { %v216_v24 = vpop.permute.xlu1 %215 }
 0x238   :  { %v218_v25 = vmul.f32 %v4389_v17, %v216_v24 }
 0x23a   :  { %220 = vrot.lane.b32.xlu1 %v218_v25, %s4569_s23 }
 0x2ac   :  { %v221_v28 = vpop.permute.xlu1 %220 }
 0x2ad   :  { %v223_v29 = vadd.f32 %v4391_v22, %v221_v28 }
 0x2af   :  { %225 = vrot.lane.b32.xlu0 %v223_v29, %s4570_s28 }
 0x321   :  { %v226_v31 = vpop.permute.xlu0 %225 }
 0x322   :  { %4103 = vmatmul.mubr.msk.f32.vlgmr.msra.gmra.mxu0 %vm121_vm3, %v226_v31 }
 0x323   :  { %4113 = vmatpush3.msra.mxu0 %v4660_v30  ;;  %4116 = vmatprep.mubr.msk.f32.mxu0 %vm4565_vm2, %v4564_v2 }
 0x324   :  { %4114 = vmatprep.subr.mxu0 %v4564_v2 }
 0x325   :  { %4115 = vmatpush3.msra.mxu0 %v4666_v32 }
 0x326   :  { %4117 = vmatmul.mubr.msk.f32.vlgmr.msra.gmra.mxu0 %vm121_vm3, %v226_v31  ;;  %4126 = vmatprep.subr.mxu0 %v4564_v2 }
 0x327   :  { %4127 = vmatpush3.msra.mxu0 %v4638_v26  ;;  %4130 = vmatprep.mubr.msk.f32.mxu0 %vm4565_vm2, %v4564_v2 }
 0x328   :  { %4128 = vmatprep.subr.mxu0 %v4564_v2 }
 0x329   :  { %4129 = vmatpush3.msra.mxu0 %v4645_v27 }
 0x32a   :  { %4140 = vmatprep.subr.mxu0 %v4564_v2 }
 0x3e2   :  { %v295_v35 = vpop.f32.mrf.mxu0 }
 0x3e3   :  { %v300_v36 = vrot.slane %v295_v35, 6 }
 0x3e4   :  { %v4104_v37 = vpop.f32.mrf.mxu0 }
 0x3e5   :  { %v302_v38 = vadd.f32 %v300_v36, %v4628_v10 }
 0x3e6   :  { %v471_v40 = vpop.f32.mrf.mxu0 }
 0x3e7   :  { %v472_v41 = vadd.f32 %v471_v40, %v401_v33  ;;  %310 = vrot.lane.b32.xlu1 %v302_v38, %s4566_s20  ;;  %v3897_v44 = vmul.f32 -1.442695, %v302_v38 }
 0x3e8   :  { %v4118_v42 = vpop.f32.mrf.mxu0 }
 0x3e9   :  { %v479_v43 = vadd.f32 %v4685_v39, %v472_v41  ;;  %4392 = vpow2.f32 %v3897_v44 }
 0x3eb   :  { %487 = vrot.lane.b32.xlu0 %v479_v43, %s4566_s20  ;;  %v3900_v45 = vmul.f32 -1.442695, %v479_v43 }
 0x3ed   :  { %4394 = vpow2.f32 %v3900_v45 }
 0x3f6   :  { %v4393_v46 = vpop.eup %4392 }
 0x3f7   :  { %v306_v47 = vadd.f32 1.0, %v4393_v46 }
 0x3f9   :  { %4396 = vrcp.f32 %v306_v47 }
 0x3fa   :  { %v4395_v48 = vpop.eup %4394 }
 0x3fb   :  { %v483_v49 = vadd.f32 1.0, %v4395_v48 }
 0x3fd   :  { %4398 = vrcp.f32 %v483_v49 }
 0x406   :  { %v4397_v50 = vpop.eup %4396 }
 0x40a   :  { %v4399_v53 = vpop.eup %4398 }
 0x459   :  { %v311_v51 = vpop.permute.xlu1 %310 }
 0x45a   :  { %v313_v52 = vmul.f32 %v4397_v50, %v311_v51 }
 0x45c   :  { %315 = vrot.lane.b32.xlu1 %v313_v52, %s4567_s21 }
 0x45d   :  { %v488_v54 = vpop.permute.xlu0 %487 }
 0x45e   :  { %v490_v55 = vmul.f32 %v4399_v53, %v488_v54 }
 0x460   :  { %492 = vrot.lane.b32.xlu0 %v490_v55, %s4567_s21 }
 0x4ce   :  { %v316_v56 = vpop.permute.xlu1 %315 }
 0x4cf   :  { %v318_v57 = vadd.f32 %v316_v56, %v302_v38  ;;  %v4765_v38 = vld [vmem:[%s5241_s1 + $0xa] ss:$0 sm:$0xff] }
 0x4d1   :  { %4400 = vtanh.f32 %v318_v57 }
 0x4d2   :  { %v493_v58 = vpop.permute.xlu0 %492 }
 0x4d3   :  { %v495_v59 = vadd.f32 %v493_v58, %v479_v43 }
 0x4d5   :  { %4402 = vtanh.f32 %v495_v59 }
 0x4de   :  { %v4401_v60 = vpop.eup %4400 }
 0x4df   :  { %v321_v61 = vrot.slane %v4401_v60, 2 }
 0x4e1   :  { %v323_v62 = vsub.f32 %v223_v29, %v321_v61 }
 0x4e2   :  { %v4403_v63 = vpop.eup %4402 }
 0x4e3   :  { %v325_v0 = vrot.slane %v323_v62, 6  ;;  %v497_v1 = vsub.f32 0.0, %v4403_v63 }
 0x4e5   :  { %326 = vrot.lane.b32.xlu1 %v325_v0, %s4568_s22  ;;  %499 = vrot.lane.b32.xlu0 %v497_v1, %s4568_s22 }
 0x557   :  { %v327_v4 = vpop.permute.xlu1 %326  ;;  %v500_v6 = vpop.permute.xlu0 %499 }
 0x558   :  { %v329_v7 = vmul.f32 %v4397_v50, %v327_v4  ;;  %v502_v9 = vmul.f32 %v4399_v53, %v500_v6 }
 0x55a   :  { %331 = vrot.lane.b32.xlu1 %v329_v7, %s4569_s23  ;;  %504 = vrot.lane.b32.xlu0 %v502_v9, %s4569_s23 }
 0x5cc   :  { %v332_v11 = vpop.permute.xlu1 %331  ;;  %v505_v12 = vpop.permute.xlu0 %504 }
 0x5cd   :  { %v4696_v13 = vadd.f32 %v4401_v60, %v332_v11  ;;  %v4698_v14 = vadd.f32 %v4403_v63, %v505_v12 }
 0x5cf   :  { %v509_v15 = vrot.slane %v4696_v13, 2  ;;  %621 = vrot.lane.b32.xlu0 %v4698_v14, %s4570_s28 }
 0x5d1   :  { %510 = vrot.lane.b32.xlu1 %v509_v15, %s4570_s28 }
 0x641   :  { %v622_v17 = vpop.permute.xlu0 %621 }
 0x642   :  { %4131 = vmatmul.mubr.msk.f32.vlgmr.msra.gmra.mxu0 %vm121_vm3, %v622_v17 }
 0x643   :  { %v511_v18 = vpop.permute.xlu1 %510  ;;  %4141 = vmatpush3.msra.mxu0 %v4707_v16  ;;  %4144 = vmatprep.mubr.msk.f32.mxu0 %vm4565_vm2, %v4564_v2 }
 0x644   :  { %4124 = vmatmul.mubr.msk.f32.vlgmr.msra.gmra.mxu1 %vm121_vm3, %v511_v18  ;;  %4142 = vmatprep.subr.mxu0 %v4564_v2 }
 0x645   :  { %4134 = vmatpush3.msra.mxu1 %v4660_v30  ;;  %4137 = vmatprep.mubr.msk.f32.mxu1 %vm4565_vm2, %v4564_v2 }
 0x646   :  { %4135 = vmatprep.subr.mxu1 %v4564_v2  ;;  %4143 = vmatpush3.msra.mxu0 %v4714_v19 }
 0x647   :  { %4136 = vmatpush3.msra.mxu1 %v4666_v32  ;;  %4145 = vmatmul.mubr.f32.vlgmr.msra.gmra.mxu0 %v4564_v2 }
 0x648   :  { %4138 = vmatmul.mubr.msk.f32.vlgmr.msra.gmra.mxu1 %vm121_vm3, %v511_v18  ;;  %4147 = vmatprep.subr.mxu1 %v4564_v2 }
 0x649   :  { %4148 = vmatpush3.msra.mxu1 %v4727_v20  ;;  %4151 = vmatprep.mubr.msk.f32.mxu1 %vm4565_vm2, %v4564_v2 }
 0x64a   :  { %4149 = vmatprep.subr.mxu1 %v4564_v2  ;;  %4154 = vmatprep.subr.mxu0 %v4564_v2 }
 0x64b   :  { %4150 = vmatpush3.msra.mxu1 %v4737_v21  ;;  %4155 = vmatpush3.msra.mxu0 %v4597_v3 }
 0x64c   :  { %4152 = vmatmul.mubr.msk.f32.vlgmr.msra.gmra.mxu1 %vm121_vm3, %v622_v17  ;;  %4161 = vmatprep.subr.mxu1 %v4564_v2 }
 0x64d   :  { %4162 = vmatpush3.msra.mxu1 %v4638_v26  ;;  %4156 = vmatprep.subr.mxu0 %v4564_v2 }
 0x64e   :  { %4163 = vmatprep.subr.mxu1 %v4564_v2  ;;  %4165 = vmatprep.mubr.msk.f32.mxu1 %vm4565_vm2, %v4564_v2 }
 0x64f   :  { %4164 = vmatpush3.msra.mxu1 %v4645_v27  ;;  %4157 = vmatpush3.msra.mxu0 %v4605_v5 }
 0x650   :  { %4158 = vmatprep.mubr.msk.f32.mxu0 %vm4565_vm2, %v4564_v2  ;;  %4168 = vmatprep.subr.mxu0 %v4564_v2 }
 0x651   :  { %4175 = vmatprep.subr.mxu1 %v4564_v2 }
 0x702   :  { %v691_v22 = vpop.f32.mrf.mxu0 }
 0x704   :  { %v580_v23 = vpop.f32.mrf.mxu1  ;;  %v4132_v24 = vpop.f32.mrf.mxu0 }
 0x705   :  { %v585_v25 = vrot.slane %v580_v23, 4 }
 0x706   :  { %v4125_v28 = vpop.f32.mrf.mxu1 }
 0x707   :  { %v587_v29 = vadd.f32 %v585_v25, %v4628_v10  ;;  %v860_v31 = vpop.f32.mrf.mxu0 }
 0x708   :  { %v761_v33 = vpop.f32.mrf.mxu1 }
 0x709   :  { %v762_v34 = vadd.f32 %v761_v33, %v691_v22  ;;  %595 = vrot.lane.b32.xlu1 %v587_v29, %s4566_s20  ;;  %v4146_v35 = vpop.f32.mrf.mxu0  ;;  %v3902_v44 = vmul.f32 -1.442695, %v587_v29 }
 0x70a   :  { %v4139_v36 = vpop.f32.mrf.mxu1 }
 0x70b   :  { %v765_v37 = vadd.f32 %v4685_v39, %v762_v34  ;;  %4404 = vpow2.f32 %v3902_v44 }
 0x70c   :  { %v930_v40 = vpop.f32.mrf.mxu1 }
 0x70d   :  { %v931_v41 = vadd.f32 %v930_v40, %v860_v31  ;;  %773 = vrot.lane.b32.xlu0 %v765_v37, %s4566_s20  ;;  %v3905_v45 = vmul.f32 -1.442695, %v765_v37 }
 0x70e   :  { %v4153_v42 = vpop.f32.mrf.mxu1 }
 0x70f   :  { %v938_v43 = vadd.f32 %v4765_v38, %v931_v41  ;;  %4406 = vpow2.f32 %v3905_v45 }
 0x711   :  { %946 = vrot.lane.b32.xlu1 %v938_v43, %s4566_s20  ;;  %v3908_v46 = vmul.f32 -1.442695, %v938_v43 }
 0x713   :  { %4408 = vpow2.f32 %v3908_v46 }
 0x718   :  { %v4405_v47 = vpop.eup %4404 }
 0x719   :  { %v591_v48 = vadd.f32 1.0, %v4405_v47 }
 0x71b   :  { %4410 = vrcp.f32 %v591_v48 }
 0x71c   :  { %v4407_v49 = vpop.eup %4406 }
 0x71d   :  { %v769_v50 = vadd.f32 1.0, %v4407_v49 }
 0x71f   :  { %4412 = vrcp.f32 %v769_v50 }
 0x720   :  { %v4409_v51 = vpop.eup %4408 }
 0x721   :  { %v942_v52 = vadd.f32 1.0, %v4409_v51 }
 0x723   :  { %4414 = vrcp.f32 %v942_v52 }
 0x728   :  { %v4411_v53 = vpop.eup %4410 }
 0x72c   :  { %v4413_v56 = vpop.eup %4412 }
 0x730   :  { %v4415_v59 = vpop.eup %4414 }
 0x77b   :  { %v596_v54 = vpop.permute.xlu1 %595 }
 0x77c   :  { %v598_v55 = vmul.f32 %v4411_v53, %v596_v54 }
 0x77e   :  { %600 = vrot.lane.b32.xlu0 %v598_v55, %s4567_s21 }
 0x77f   :  { %v774_v57 = vpop.permute.xlu0 %773 }
 0x780   :  { %v776_v58 = vmul.f32 %v4413_v56, %v774_v57 }
 0x782   :  { %778 = vrot.lane.b32.xlu1 %v776_v58, %s4567_s21 }
 0x783   :  { %v947_v60 = vpop.permute.xlu1 %946 }
 0x784   :  { %v949_v61 = vmul.f32 %v4415_v59, %v947_v60 }
 0x786   :  { %951 = vrot.lane.b32.xlu0 %v949_v61, %s4567_s21 }
 0x7f0   :  { %v601_v62 = vpop.permute.xlu0 %600 }
 0x7f1   :  { %v603_v63 = vadd.f32 %v601_v62, %v587_v29 }
 0x7f3   :  { %4416 = vtanh.f32 %v603_v63 }
 0x7f4   :  { %v779_v0 = vpop.permute.xlu1 %778 }
 0x7f5   :  { %v781_v1 = vadd.f32 %v779_v0, %v765_v37 }
 0x7f7   :  { %4418 = vtanh.f32 %v781_v1 }
 0x7f8   :  { %v952_v4 = vpop.permute.xlu0 %951 }
 0x7f9   :  { %v954_v6 = vadd.f32 %v952_v4, %v938_v43 }
 0x7fb   :  { %4420 = vtanh.f32 %v954_v6 }
 0x800   :  { %v4417_v7 = vpop.eup %4416 }
 0x801   :  { %v606_v9 = vrot.slane %v4417_v7, 2 }
 0x803   :  { %v608_v11 = vsub.f32 %v4696_v13, %v606_v9 }
 0x804   :  { %v4419_v12 = vpop.eup %4418 }
 0x805   :  { %v610_v15 = vrot.slane %v608_v11, 6  ;;  %v783_v17 = vsub.f32 %v4698_v14, %v4419_v12 }
 0x807   :  { %611 = vrot.lane.b32.xlu1 %v610_v15, %s4568_s22  ;;  %785 = vrot.lane.b32.xlu0 %v783_v17, %s4568_s22 }
 0x808   :  { %v4421_v18 = vpop.eup %4420 }
 0x809   :  { %v956_v22 = vsub.f32 0.0, %v4421_v18 }
 0x80b   :  { %958 = vrot.lane.b32.xlu1 %v956_v22, %s4568_s22 }
 0x879   :  { %v612_v23 = vpop.permute.xlu1 %611  ;;  %v786_v24 = vpop.permute.xlu0 %785 }
 0x87a   :  { %v614_v25 = vmul.f32 %v4411_v53, %v612_v23  ;;  %v788_v28 = vmul.f32 %v4413_v56, %v786_v24 }
 0x87c   :  { %616 = vrot.lane.b32.xlu0 %v614_v25, %s4569_s23  ;;  %790 = vrot.lane.b32.xlu1 %v788_v28, %s4569_s23 }
 0x87d   :  { %v959_v13 = vpop.permute.xlu1 %958 }
 0x87e   :  { %v961_v29 = vmul.f32 %v4415_v59, %v959_v13 }
 0x880   :  { %963 = vrot.lane.b32.xlu0 %v961_v29, %s4569_s23 }
 0x8ee   :  { %v791_v14 = vpop.permute.xlu1 %790  ;;  %v617_v31 = vpop.permute.xlu0 %616 }
 0x8ef   :  { %v4781_v33 = vadd.f32 %v4419_v12, %v791_v14  ;;  %v4783_v34 = vadd.f32 %v4417_v7, %v617_v31 }
 0x8f1   :  { %v968_v35 = vrot.slane %v4783_v34, 4  ;;  %1080 = vrot.lane.b32.xlu0 %v4781_v33, %s4570_s28 }
 0x8f2   :  { %v964_v36 = vpop.permute.xlu0 %963 }
 0x8f3   :  { %969 = vrot.lane.b32.xlu1 %v968_v35, %s4570_s28  ;;  %v4789_v37 = vadd.f32 %v4421_v18, %v964_v36 }
 0x8f7   :  { %1254 = vrot.lane.b32.xlu1 %v4789_v37, %s4570_s28 }
 0x963   :  { %v1081_v40 = vpop.permute.xlu0 %1080 }
 0x964   :  { %4166 = vmatmul.mubr.msk.f32.vlgmr.msra.gmra.mxu1 %vm121_vm3, %v1081_v40 }
 0x965   :  { %v970_v41 = vpop.permute.xlu1 %969  ;;  %4176 = vmatpush3.msra.mxu1 %v4707_v16  ;;  %4179 = vmatprep.mubr.msk.f32.mxu1 %vm4565_vm2, %v4564_v2 }
 0x966   :  { %4159 = vmatmul.mubr.msk.f32.vlgmr.msra.gmra.mxu0 %vm121_vm3, %v970_v41  ;;  %4177 = vmatprep.subr.mxu1 %v4564_v2 }
 0x967   :  { %4169 = vmatpush3.msra.mxu0 %v4660_v30  ;;  %4172 = vmatprep.mubr.msk.f32.mxu0 %vm4565_vm2, %v4564_v2 }
 0x968   :  { %4170 = vmatprep.subr.mxu0 %v4564_v2  ;;  %4178 = vmatpush3.msra.mxu1 %v4714_v19 }
 0x969   :  { %4171 = vmatpush3.msra.mxu0 %v4666_v32  ;;  %v1255_v42 = vpop.permute.xlu1 %1254  ;;  %4189 = vmatprep.subr.mxu1 %v4564_v2 }
 0x96a   :  { %4173 = vmatmul.mubr.msk.f32.vlgmr.msra.gmra.mxu0 %vm121_vm3, %v970_v41  ;;  %4180 = vmatmul.mubr.msk.f32.vlgmr.msra.gmra.mxu1 %vm121_vm3, %v1255_v42 }
 0x96b   :  { %4182 = vmatprep.subr.mxu0 %v4564_v2  ;;  %4186 = vmatprep.mubr.msk.f32.mxu0 %vm4565_vm2, %v4564_v2 }
 0x96c   :  { %4183 = vmatpush3.msra.mxu0 %v4727_v20  ;;  %4190 = vmatpush3.msra.mxu1 %v4597_v3 }
 0x96d   :  { %4184 = vmatprep.subr.mxu0 %v4564_v2  ;;  %4191 = vmatprep.subr.mxu1 %v4564_v2 }
 0x96e   :  { %4185 = vmatpush3.msra.mxu0 %v4737_v21  ;;  %4192 = vmatpush3.msra.mxu1 %v4605_v5 }
 0x96f   :  { %4187 = vmatmul.mubr.msk.f32.vlgmr.msra.gmra.mxu0 %vm121_vm3, %v1081_v40  ;;  %4196 = vmatprep.subr.mxu0 %v4564_v2 }
 0x970   :  { %4197 = vmatpush3.msra.mxu0 %v4638_v26  ;;  %4200 = vmatprep.mubr.msk.f32.mxu0 %vm4565_vm2, %v4564_v2 }
 0x971   :  { %4198 = vmatprep.subr.mxu0 %v4564_v2  ;;  %4193 = vmatprep.mubr.msk.f32.mxu1 %vm4565_vm2, %v4564_v2 }
 0x972   :  { %4199 = vmatpush3.msra.mxu0 %v4645_v27  ;;  %4203 = vmatprep.subr.mxu1 %v4564_v2 }
 0x973   :  { %4210 = vmatprep.subr.mxu0 %v4564_v2 }
 0xa24   :  { %v1150_v43 = vpop.f32.mrf.mxu1 }
 0xa26   :  { %v1039_v44 = vpop.f32.mrf.mxu0  ;;  %v4167_v45 = vpop.f32.mrf.mxu1 }
 0xa27   :  { %v1044_v46 = vrot.slane %v1039_v44, 2 }
 0xa28   :  { %v4160_v47 = vpop.f32.mrf.mxu0 }
 0xa29   :  { %v1046_v48 = vadd.f32 %v1044_v46, %v4628_v10 }
 0xa2a   :  { %v1220_v49 = vpop.f32.mrf.mxu0  ;;  %v1324_v50 = vpop.f32.mrf.mxu1 }
 0xa2b   :  { %v1221_v51 = vadd.f32 %v1220_v49, %v1150_v43  ;;  %1054 = vrot.lane.b32.xlu0 %v1046_v48, %s4566_s20  ;;  %v3910_v59 = vmul.f32 -1.442695, %v1046_v48 }
 0xa2c   :  { %v4174_v52 = vpop.f32.mrf.mxu0  ;;  %v4181_v53 = vpop.f32.mrf.mxu1 }
 0xa2d   :  { %v1224_v54 = vadd.f32 %v4685_v39, %v1221_v51  ;;  %4422 = vpow2.f32 %v3910_v59 }
 0xa2f   :  { %v1394_v55 = vpop.f32.mrf.mxu0  ;;  %1232 = vrot.lane.b32.xlu1 %v1224_v54, %s4566_s20  ;;  %v3913_v10 = vmul.f32 -1.442695, %v1224_v54 }
 0xa30   :  { %v1395_v56 = vadd.f32 %v1394_v55, %v1324_v50 }
 0xa31   :  { %v4188_v57 = vpop.f32.mrf.mxu0  ;;  %4424 = vpow2.f32 %v3913_v10 }
 0xa32   :  { %v1398_v58 = vadd.f32 %v4765_v38, %v1395_v56 }
 0xa34   :  { %1406 = vrot.lane.b32.xlu0 %v1398_v58, %s4566_s20  ;;  %v3916_v60 = vmul.f32 -1.442695, %v1398_v58 }
 0xa36   :  { %4426 = vpow2.f32 %v3916_v60 }
 0xa3a   :  { %v4423_v61 = vpop.eup %4422 }
 0xa3b   :  { %v1050_v62 = vadd.f32 1.0, %v4423_v61 }
 0xa3d   :  { %4428 = vrcp.f32 %v1050_v62 }
 0xa3e   :  { %v4425_v63 = vpop.eup %4424 }
 0xa3f   :  { %v1228_v0 = vadd.f32 1.0, %v4425_v63 }
 0xa41   :  { %4430 = vrcp.f32 %v1228_v0 }
 0xa43   :  { %v4427_v1 = vpop.eup %4426 }
 0xa44   :  { %v1402_v4 = vadd.f32 1.0, %v4427_v1 }
 0xa46   :  { %4432 = vrcp.f32 %v1402_v4 }
 0xa4a   :  { %v4429_v6 = vpop.eup %4428 }
 0xa4e   :  { %v4431_v11 = vpop.eup %4430 }
 0xa53   :  { %v4433_v17 = vpop.eup %4432 }
 0xa9d   :  { %v1055_v7 = vpop.permute.xlu0 %1054 }
 0xa9e   :  { %v1057_v9 = vmul.f32 %v4429_v6, %v1055_v7 }
 0xaa0   :  { %1059 = vrot.lane.b32.xlu1 %v1057_v9, %s4567_s21 }
 0xaa1   :  { %v1233_v12 = vpop.permute.xlu1 %1232 }
 0xaa2   :  { %v1235_v15 = vmul.f32 %v4431_v11, %v1233_v12 }
 0xaa4   :  { %1237 = vrot.lane.b32.xlu0 %v1235_v15, %s4567_s21 }
 0xaa6   :  { %v1407_v18 = vpop.permute.xlu0 %1406 }
 0xaa7   :  { %v1409_v22 = vmul.f32 %v4433_v17, %v1407_v18 }
 0xaa9   :  { %1411 = vrot.lane.b32.xlu1 %v1409_v22, %s4567_s21 }
 0xb12   :  { %v1060_v23 = vpop.permute.xlu1 %1059 }
 0xb13   :  { %v1062_v24 = vadd.f32 %v1060_v23, %v1046_v48 }
 0xb15   :  { %4434 = vtanh.f32 %v1062_v24 }
 0xb16   :  { %v1238_v25 = vpop.permute.xlu0 %1237 }
 0xb17   :  { %v1240_v28 = vadd.f32 %v1238_v25, %v1224_v54 }
 0xb19   :  { %4436 = vtanh.f32 %v1240_v28 }
 0xb1b   :  { %v1412_v13 = vpop.permute.xlu1 %1411 }
 0xb1c   :  { %v1414_v29 = vadd.f32 %v1412_v13, %v1398_v58 }
 0xb1e   :  { %4438 = vtanh.f32 %v1414_v29 }
 0xb22   :  { %v4435_v14 = vpop.eup %4434 }
 0xb23   :  { %v1065_v31 = vrot.slane %v4435_v14, 2 }
 0xb25   :  { %v1067_v35 = vsub.f32 %v4783_v34, %v1065_v31 }
 0xb26   :  { %v4437_v36 = vpop.eup %4436 }
 0xb27   :  { %v1069_v40 = vrot.slane %v1067_v35, 6  ;;  %v1242_v41 = vsub.f32 %v4781_v33, %v4437_v36 }
 0xb29   :  { %1070 = vrot.lane.b32.xlu0 %v1069_v40, %s4568_s22  ;;  %1244 = vrot.lane.b32.xlu1 %v1242_v41, %s4568_s22 }
 0xb2b   :  { %v4439_v42 = vpop.eup %4438 }
 0xb2c   :  { %v1416_v43 = vsub.f32 %v4789_v37, %v4439_v42 }
 0xb2e   :  { %1418 = vrot.lane.b32.xlu0 %v1416_v43, %s4568_s22 }
 0xb9b   :  { %v1071_v44 = vpop.permute.xlu0 %1070  ;;  %v1245_v45 = vpop.permute.xlu1 %1244 }
 0xb9c   :  { %v1073_v46 = vmul.f32 %v4429_v6, %v1071_v44  ;;  %v1247_v47 = vmul.f32 %v4431_v11, %v1245_v45 }
 0xb9e   :  { %1075 = vrot.lane.b32.xlu1 %v1073_v46, %s4569_s23  ;;  %1249 = vrot.lane.b32.xlu0 %v1247_v47, %s4569_s23 }
 0xba0   :  { %v1419_v34 = vpop.permute.xlu0 %1418 }
 0xba1   :  { %v1421_v48 = vmul.f32 %v4433_v17, %v1419_v34 }
 0xba3   :  { %1423 = vrot.lane.b32.xlu1 %v1421_v48, %s4569_s23 }
 0xc10   :  { %v1250_v33 = vpop.permute.xlu0 %1249  ;;  %v1076_v49 = vpop.permute.xlu1 %1075 }
 0xc11   :  { %v4846_v50 = vadd.f32 %v4437_v36, %v1250_v33  ;;  %v4848_v51 = vadd.f32 %v4435_v14, %v1076_v49 }
 0xc13   :  { %v1428_v37 = vrot.slane %v4848_v51, 6  ;;  %1537 = vrot.lane.b32.xlu1 %v4846_v50, %s4570_s28 }
 0xc15   :  { %v1424_v52 = vpop.permute.xlu1 %1423  ;;  %1429 = vrot.lane.b32.xlu0 %v1428_v37, %s4570_s28 }
 0xc16   :  { %v4854_v53 = vadd.f32 %v4439_v42, %v1424_v52 }
 0xc19   :  { %1711 = vrot.lane.b32.xlu0 %v4854_v53, %s4570_s28 }
 0xc85   :  { %v1538_v54 = vpop.permute.xlu1 %1537 }
 0xc86   :  { %4201 = vmatmul.mubr.msk.f32.vlgmr.msra.gmra.mxu0 %vm121_vm3, %v1538_v54 }
 0xc87   :  { %v1430_v55 = vpop.permute.xlu0 %1429  ;;  %4211 = vmatpush3.msra.mxu0 %v4707_v16  ;;  %4214 = vmatprep.mubr.msk.f32.mxu0 %vm4565_vm2, %v4564_v2 }
 0xc88   :  { %4194 = vmatmul.mubr.msk.f32.vlgmr.msra.gmra.mxu1 %vm121_vm3, %v1430_v55  ;;  %4212 = vmatprep.subr.mxu0 %v4564_v2 }
 0xc89   :  { %4204 = vmatpush3.msra.mxu1 %v4660_v30  ;;  %4207 = vmatprep.mubr.msk.f32.mxu1 %vm4565_vm2, %v4564_v2 }
 0xc8a   :  { %4205 = vmatprep.subr.mxu1 %v4564_v2  ;;  %4213 = vmatpush3.msra.mxu0 %v4714_v19 }
 0xc8b   :  { %4206 = vmatpush3.msra.mxu1 %v4666_v32  ;;  %v1712_v56 = vpop.permute.xlu0 %1711  ;;  %4224 = vmatprep.subr.mxu0 %v4564_v2 }
 0xc8c   :  { %4208 = vmatmul.mubr.msk.f32.vlgmr.msra.gmra.mxu1 %vm121_vm3, %v1430_v55  ;;  %4215 = vmatmul.mubr.msk.f32.vlgmr.msra.gmra.mxu0 %vm121_vm3, %v1712_v56 }
 0xc8d   :  { %4217 = vmatprep.subr.mxu1 %v4564_v2  ;;  %4221 = vmatprep.mubr.msk.f32.mxu1 %vm4565_vm2, %v4564_v2 }
 0xc8e   :  { %4218 = vmatpush3.msra.mxu1 %v4727_v20  ;;  %4225 = vmatpush3.msra.mxu0 %v4597_v3 }
 0xc8f   :  { %4219 = vmatprep.subr.mxu1 %v4564_v2  ;;  %4226 = vmatprep.subr.mxu0 %v4564_v2 }
 0xc90   :  { %4220 = vmatpush3.msra.mxu1 %v4737_v21  ;;  %4227 = vmatpush3.msra.mxu0 %v4605_v5 }
 0xc91   :  { %4222 = vmatmul.mubr.msk.f32.vlgmr.msra.gmra.mxu1 %vm121_vm3, %v1538_v54  ;;  %4231 = vmatprep.subr.mxu1 %v4564_v2 }
 0xc92   :  { %4228 = vmatprep.mubr.msk.f32.mxu0 %vm4565_vm2, %v4564_v2  ;;  %4232 = vmatpush3.msra.mxu1 %v4638_v26 }
 0xc93   :  { %4233 = vmatprep.subr.mxu1 %v4564_v2  ;;  %4238 = vmatprep.subr.mxu0 %v4564_v2 }
 0xc94   :  { %4234 = vmatpush3.msra.mxu1 %v4645_v27  ;;  %4235 = vmatprep.mubr.msk.f32.mxu1 %vm4565_vm2, %v4564_v2 }
 0xc95   :  { %4245 = vmatprep.subr.mxu1 %v4564_v2 }
 0xd46   :  { %v1607_v3 = vpop.f32.mrf.mxu0 }
 0xd48   :  { %v1499_v5 = vpop.f32.mrf.mxu1  ;;  %v4202_v57 = vpop.f32.mrf.mxu0 }
 0xd49   :  { %v1503_v58 = vadd.f32 %v1499_v5, %v4626_v8 }
 0xd4a   :  { %v4195_v59 = vpop.f32.mrf.mxu1 }
 0xd4b   :  { %1511 = vrot.lane.b32.xlu1 %v1503_v58, %s4566_s20  ;;  %v3918_v9 = vmul.f32 -1.442695, %v1503_v58 }
 0xd4c   :  { %v1677_v10 = vpop.f32.mrf.mxu1  ;;  %v1781_v60 = vpop.f32.mrf.mxu0 }
 0xd4d   :  { %v1678_v61 = vadd.f32 %v1677_v10, %v1607_v3  ;;  %4440 = vpow2.f32 %v3918_v9 }
 0xd4e   :  { %v4209_v62 = vpop.f32.mrf.mxu1  ;;  %v4216_v63 = vpop.f32.mrf.mxu0 }
 0xd4f   :  { %v1681_v0 = vadd.f32 %v4685_v39, %v1678_v61 }
 0xd51   :  { %v1851_v1 = vpop.f32.mrf.mxu1  ;;  %1689 = vrot.lane.b32.xlu0 %v1681_v0, %s4566_s20  ;;  %v3921_v11 = vmul.f32 -1.442695, %v1681_v0 }
 0xd52   :  { %v1852_v4 = vadd.f32 %v1851_v1, %v1781_v60 }
 0xd53   :  { %v4223_v6 = vpop.f32.mrf.mxu1  ;;  %4442 = vpow2.f32 %v3921_v11 }
 0xd54   :  { %v1855_v7 = vadd.f32 %v4765_v38, %v1852_v4 }
 0xd56   :  { %1863 = vrot.lane.b32.xlu1 %v1855_v7, %s4566_s20  ;;  %v3924_v12 = vmul.f32 -1.442695, %v1855_v7 }
 0xd58   :  { %4444 = vpow2.f32 %v3924_v12 }
 0xd5a   :  { %v4441_v15 = vpop.eup %4440 }
 0xd5b   :  { %v1507_v17 = vadd.f32 1.0, %v4441_v15 }
 0xd5d   :  { %4446 = vrcp.f32 %v1507_v17 }
 0xd60   :  { %v4443_v18 = vpop.eup %4442 }
 0xd61   :  { %v1685_v22 = vadd.f32 1.0, %v4443_v18 }
 0xd63   :  { %4448 = vrcp.f32 %v1685_v22 }
 0xd65   :  { %v4445_v23 = vpop.eup %4444 }
 0xd66   :  { %v1859_v24 = vadd.f32 1.0, %v4445_v23 }
 0xd68   :  { %4450 = vrcp.f32 %v1859_v24 }
 0xd6a   :  { %v4447_v25 = vpop.eup %4446 }
 0xd70   :  { %v4449_v29 = vpop.eup %4448 }
 0xd75   :  { %v4451_v35 = vpop.eup %4450 }
 0xdbd   :  { %v1512_v28 = vpop.permute.xlu1 %1511 }
 0xdbe   :  { %v1514_v13 = vmul.f32 %v4447_v25, %v1512_v28 }
 0xdc0   :  { %1516 = vrot.lane.b32.xlu0 %v1514_v13, %s4567_s21 }
 0xdc3   :  { %v1690_v14 = vpop.permute.xlu0 %1689 }
 0xdc4   :  { %v1692_v31 = vmul.f32 %v4449_v29, %v1690_v14 }
 0xdc6   :  { %1694 = vrot.lane.b32.xlu1 %v1692_v31, %s4567_s21 }
 0xdc8   :  { %v1864_v36 = vpop.permute.xlu1 %1863 }
 0xdc9   :  { %v1866_v40 = vmul.f32 %v4451_v35, %v1864_v36 }
 0xdcb   :  { %1868 = vrot.lane.b32.xlu0 %v1866_v40, %s4567_s21 }
 0xe32   :  { %v1517_v41 = vpop.permute.xlu0 %1516 }
 0xe33   :  { %v1519_v42 = vadd.f32 %v1517_v41, %v1503_v58 }
 0xe35   :  { %4452 = vtanh.f32 %v1519_v42 }
 0xe38   :  { %v1695_v43 = vpop.permute.xlu1 %1694 }
 0xe39   :  { %v1697_v44 = vadd.f32 %v1695_v43, %v1681_v0 }
 0xe3b   :  { %4454 = vtanh.f32 %v1697_v44 }
 0xe3d   :  { %v1869_v45 = vpop.permute.xlu0 %1868 }
 0xe3e   :  { %v1871_v46 = vadd.f32 %v1869_v45, %v1855_v7 }
 0xe40   :  { %4456 = vtanh.f32 %v1871_v46 }
 0xe42   :  { %v4453_v47 = vpop.eup %4452 }
 0xe43   :  { %v1522_v34 = vrot.slane %v4453_v47, 2 }
 0xe45   :  { %v1524_v48 = vsub.f32 %v4848_v51, %v1522_v34 }
 0xe47   :  { %v1526_v33 = vrot.slane %v1524_v48, 6 }
 0xe48   :  { %v4455_v49 = vpop.eup %4454 }
 0xe49   :  { %1527 = vrot.lane.b32.xlu1 %v1526_v33, %s4568_s22  ;;  %v1699_v37 = vsub.f32 %v4846_v50, %v4455_v49 }
 0xe4b   :  { %1701 = vrot.lane.b32.xlu0 %v1699_v37, %s4568_s22 }
 0xe4d   :  { %v4457_v52 = vpop.eup %4456 }
 0xe4e   :  { %v1873_v54 = vsub.f32 %v4854_v53, %v4457_v52 }
 0xe50   :  { %1875 = vrot.lane.b32.xlu1 %v1873_v54, %s4568_s22 }
 0xebb   :  { %v1528_v55 = vpop.permute.xlu1 %1527 }
 0xebc   :  { %v1530_v56 = vmul.f32 %v4447_v25, %v1528_v55 }
 0xebd   :  { %v1702_v3 = vpop.permute.xlu0 %1701 }
 0xebe   :  { %v1704_v5 = vmul.f32 %v4449_v29, %v1702_v3  ;;  %1532 = vrot.lane.b32.xlu0 %v1530_v56, %s4569_s23 }
 0xec0   :  { %1706 = vrot.lane.b32.xlu1 %v1704_v5, %s4569_s23 }
 0xec2   :  { %v1876_v51 = vpop.permute.xlu1 %1875 }
 0xec3   :  { %v1878_v57 = vmul.f32 %v4451_v35, %v1876_v51 }
 0xec5   :  { %1880 = vrot.lane.b32.xlu0 %v1878_v57, %s4569_s23 }
 0xf30   :  { %v1533_v50 = vpop.permute.xlu0 %1532 }
 0xf31   :  { %v4911_v58 = vadd.f32 %v4453_v47, %v1533_v50 }
 0xf32   :  { %v1707_v59 = vpop.permute.xlu1 %1706 }
 0xf33   :  { %v4913_v10 = vadd.f32 %v4455_v49, %v1707_v59  ;;  %1885 = vrot.lane.b32.xlu1 %v4911_v58, %s4570_s28 }
 0xf35   :  { %1996 = vrot.lane.b32.xlu0 %v4913_v10, %s4570_s28 }
 0xf37   :  { %v1881_v53 = vpop.permute.xlu0 %1880 }
 0xf38   :  { %v4919_v60 = vadd.f32 %v4457_v52, %v1881_v53 }
 0xf3a   :  { %2170 = vrot.lane.b32.xlu1 %v4919_v60, %s4570_s28 }
 0xfa5   :  { %v1886_v61 = vpop.permute.xlu1 %1885 }
 0xfa6   :  { %4229 = vmatmul.mubr.msk.f32.vlgmr.msra.gmra.mxu0 %vm121_vm3, %v1886_v61 }
 0xfa7   :  { %4239 = vmatpush3.msra.mxu0 %v4660_v30  ;;  %v1997_v62 = vpop.permute.xlu0 %1996  ;;  %4242 = vmatprep.mubr.msk.f32.mxu0 %vm4565_vm2, %v4564_v2 }
 0xfa8   :  { %4236 = vmatmul.mubr.msk.f32.vlgmr.msra.gmra.mxu1 %vm121_vm3, %v1997_v62  ;;  %4240 = vmatprep.subr.mxu0 %v4564_v2 }
 0xfa9   :  { %4241 = vmatpush3.msra.mxu0 %v4666_v32  ;;  %4246 = vmatpush3.msra.mxu1 %v4707_v16  ;;  %v4950_v32 = vld [vmem:[%s5241_s1 + $0x18] sm:$0xff] }
 0xfaa   :  { %4243 = vmatmul.mubr.msk.f32.vlgmr.msra.gmra.mxu0 %vm121_vm3, %v1886_v61  ;;  %4247 = vmatprep.subr.mxu1 %v4564_v2 }
 0xfab   :  { %4252 = vmatprep.subr.mxu0 %v4564_v2  ;;  %4248 = vmatpush3.msra.mxu1 %v4714_v19 }
 0xfac   :  { %4253 = vmatpush3.msra.mxu0 %v4727_v20  ;;  %v2171_v30 = vpop.permute.xlu1 %2170  ;;  %4249 = vmatprep.mubr.msk.f32.mxu1 %vm4565_vm2, %v4564_v2 }
 0xfad   :  { %4250 = vmatmul.mubr.msk.f32.vlgmr.msra.gmra.mxu1 %vm121_vm3, %v2171_v30  ;;  %4254 = vmatprep.subr.mxu0 %v4564_v2 }
 0xfae   :  { %4255 = vmatpush3.msra.mxu0 %v4737_v21  ;;  %4256 = vmatprep.mubr.msk.f32.mxu0 %vm4565_vm2, %v4564_v2 }
 0xfaf   :  { %4257 = vmatmul.mubr.msk.f32.vlgmr.msra.gmra.mxu0 %vm121_vm3, %v1997_v62  ;;  %4266 = vmatprep.subr.mxu0 %v4564_v2 }
 0xfb0   :  { %4259 = vmatprep.subr.mxu1 %v4564_v2  ;;  %4267 = vmatpush3.msra.mxu0 %v4638_v26  ;;  %v4961_v26 = vld [vmem:[%s5241_s1 + $0x10] sm:$0xff] }
 0xfb1   :  { %4260 = vmatpush3.msra.mxu1 %v4950_v32  ;;  %4268 = vmatprep.subr.mxu0 %v4564_v2 }
 0xfb2   :  { %4261 = vmatprep.subr.mxu1 %v4564_v2  ;;  %4269 = vmatpush3.msra.mxu0 %v4645_v27 }
 0xfb3   :  { %4270 = vmatprep.mubr.msk.f32.mxu0 %vm4565_vm2, %v4564_v2  ;;  %4262 = vmatpush3.msra.mxu1 %v4961_v26 }
 0xfb4   :  { %4263 = vmatprep.mubr.msk.f32.mxu1 %vm4565_vm2, %v4564_v2  ;;  %4273 = vmatprep.subr.mxu1 %v4564_v2 }
 0xfb5   :  { %4280 = vmatprep.subr.mxu0 %v4564_v2 }
0x1066   :  { %v1955_v63 = vpop.f32.mrf.mxu0 }
0x1067   :  { %v1960_v0 = vrot.slane %v1955_v63, 6 }
0x1068   :  { %v4230_v27 = vpop.f32.mrf.mxu0  ;;  %v2066_v1 = vpop.f32.mrf.mxu1 }
0x1069   :  { %v1962_v4 = vadd.f32 %v1960_v0, %v4626_v8 }
0x106a   :  { %v4237_v6 = vpop.f32.mrf.mxu1  ;;  %v2136_v7 = vpop.f32.mrf.mxu0 }
0x106b   :  { %v2137_v9 = vadd.f32 %v2136_v7, %v2066_v1  ;;  %1970 = vrot.lane.b32.xlu0 %v1962_v4, %s4566_s20  ;;  %v3926_v25 = vmul.f32 -1.442695, %v1962_v4 }
0x106c   :  { %v4244_v11 = vpop.f32.mrf.mxu0 }
0x106d   :  { %v2140_v12 = vadd.f32 %v4685_v39, %v2137_v9  ;;  %v2240_v15 = vpop.f32.mrf.mxu1  ;;  %4458 = vpow2.f32 %v3926_v25  ;;  %v5007_v11 = vld [vmem:[%s5241_s1 + $0x48] sm:$0xff] }
0x106f   :  { %v4251_v17 = vpop.f32.mrf.mxu1  ;;  %v2310_v18 = vpop.f32.mrf.mxu0  ;;  %2148 = vrot.lane.b32.xlu1 %v2140_v12, %s4566_s20  ;;  %v3929_v28 = vmul.f32 -1.442695, %v2140_v12 }
0x1070   :  { %v2311_v22 = vadd.f32 %v2310_v18, %v2240_v15 }
0x1071   :  { %v4258_v23 = vpop.f32.mrf.mxu0  ;;  %4460 = vpow2.f32 %v3929_v28 }
0x1072   :  { %v2314_v24 = vadd.f32 %v4765_v38, %v2311_v22 }
0x1074   :  { %2322 = vrot.lane.b32.xlu0 %v2314_v24, %s4566_s20  ;;  %v3932_v13 = vmul.f32 -1.442695, %v2314_v24 }
0x1076   :  { %4462 = vpow2.f32 %v3932_v13  ;;  %v5058_v13 = vld [vmem:[%s5241_s1 + $0x9] ss:$0 sm:$0xff] }
0x107a   :  { %v4459_v29 = vpop.eup %4458 }
0x107b   :  { %v1966_v14 = vadd.f32 1.0, %v4459_v29 }
0x107d   :  { %4464 = vrcp.f32 %v1966_v14 }
0x107e   :  { %v4461_v39 = vpop.eup %4460 }
0x107f   :  { %v2144_v31 = vadd.f32 1.0, %v4461_v39 }
0x1081   :  { %4466 = vrcp.f32 %v2144_v31 }
0x1083   :  { %v4463_v35 = vpop.eup %4462 }
0x1084   :  { %v2318_v36 = vadd.f32 1.0, %v4463_v35 }
0x1086   :  { %4468 = vrcp.f32 %v2318_v36 }
0x108a   :  { %v4465_v40 = vpop.eup %4464 }
0x108e   :  { %v4467_v43 = vpop.eup %4466 }
0x1093   :  { %v4469_v46 = vpop.eup %4468 }
0x10dd   :  { %v1971_v41 = vpop.permute.xlu0 %1970 }
0x10de   :  { %v1973_v42 = vmul.f32 %v4465_v40, %v1971_v41 }
0x10e0   :  { %1975 = vrot.lane.b32.xlu1 %v1973_v42, %s4567_s21 }
0x10e1   :  { %v2149_v44 = vpop.permute.xlu1 %2148 }
0x10e2   :  { %v2151_v45 = vmul.f32 %v4467_v43, %v2149_v44 }
0x10e4   :  { %2153 = vrot.lane.b32.xlu0 %v2151_v45, %s4567_s21 }
0x10e6   :  { %v2323_v47 = vpop.permute.xlu0 %2322 }
0x10e7   :  { %v2325_v34 = vmul.f32 %v4469_v46, %v2323_v47 }
0x10e9   :  { %2327 = vrot.lane.b32.xlu1 %v2325_v34, %s4567_s21 }
0x1152   :  { %v1976_v48 = vpop.permute.xlu1 %1975 }
0x1153   :  { %v1978_v33 = vadd.f32 %v1976_v48, %v1962_v4 }
0x1155   :  { %4470 = vtanh.f32 %v1978_v33 }
0x1156   :  { %v2154_v49 = vpop.permute.xlu0 %2153 }
0x1157   :  { %v2156_v37 = vadd.f32 %v2154_v49, %v2140_v12 }
0x1159   :  { %4472 = vtanh.f32 %v2156_v37 }
0x115b   :  { %v2328_v52 = vpop.permute.xlu1 %2327 }
0x115c   :  { %v2330_v54 = vadd.f32 %v2328_v52, %v2314_v24 }
0x115e   :  { %4474 = vtanh.f32 %v2330_v54 }
0x1162   :  { %v4471_v55 = vpop.eup %4470 }
0x1163   :  { %v1981_v56 = vrot.slane %v4471_v55, 2 }
0x1165   :  { %v1983_v3 = vsub.f32 %v4911_v58, %v1981_v56 }
0x1166   :  { %v4473_v5 = vpop.eup %4472 }
0x1167   :  { %v1985_v51 = vrot.slane %v1983_v3, 6  ;;  %v2158_v57 = vsub.f32 %v4913_v10, %v4473_v5 }
0x1169   :  { %1986 = vrot.lane.b32.xlu0 %v1985_v51, %s4568_s22  ;;  %2160 = vrot.lane.b32.xlu1 %v2158_v57, %s4568_s22 }
0x116b   :  { %v4475_v50 = vpop.eup %4474 }
0x116c   :  { %v2332_v59 = vsub.f32 %v4919_v60, %v4475_v50 }
0x116e   :  { %2334 = vrot.lane.b32.xlu0 %v2332_v59, %s4568_s22 }
0x11db   :  { %v1987_v53 = vpop.permute.xlu0 %1986  ;;  %v2161_v61 = vpop.permute.xlu1 %2160 }
0x11dc   :  { %v1989_v62 = vmul.f32 %v4465_v40, %v1987_v53  ;;  %v2163_v30 = vmul.f32 %v4467_v43, %v2161_v61 }
0x11de   :  { %1991 = vrot.lane.b32.xlu1 %v1989_v62, %s4569_s23  ;;  %2165 = vrot.lane.b32.xlu0 %v2163_v30, %s4569_s23 }
0x11e0   :  { %v2335_v58 = vpop.permute.xlu0 %2334 }
0x11e1   :  { %v2337_v63 = vmul.f32 %v4469_v46, %v2335_v58 }
0x11e3   :  { %2339 = vrot.lane.b32.xlu1 %v2337_v63, %s4569_s23 }
0x1250   :  { %v2166_v10 = vpop.permute.xlu0 %2165  ;;  %v1992_v0 = vpop.permute.xlu1 %1991 }
0x1251   :  { %v4986_v27 = vadd.f32 %v4473_v5, %v2166_v10  ;;  %v4988_v1 = vadd.f32 %v4471_v55, %v1992_v0 }
0x1253   :  { %v2344_v60 = vrot.slane %v4988_v1, 2  ;;  %2456 = vrot.lane.b32.xlu1 %v4986_v27, %s4570_s28 }
0x1255   :  { %v2340_v4 = vpop.permute.xlu1 %2339  ;;  %2345 = vrot.lane.b32.xlu0 %v2344_v60, %s4570_s28 }
0x1256   :  { %v4994_v6 = vadd.f32 %v4475_v50, %v2340_v4 }
0x1259   :  { %2630 = vrot.lane.b32.xlu0 %v4994_v6, %s4570_s28 }
0x12c5   :  { %v2457_v7 = vpop.permute.xlu1 %2456 }
0x12c6   :  { %4271 = vmatmul.mubr.msk.f32.vlgmr.msra.gmra.mxu0 %vm121_vm3, %v2457_v7 }
0x12c7   :  { %v2346_v9 = vpop.permute.xlu0 %2345  ;;  %4281 = vmatpush3.msra.mxu0 %v4707_v16  ;;  %4284 = vmatprep.mubr.msk.f32.mxu0 %vm4565_vm2, %v4564_v2  ;;  %v5017_v16 = vld [vmem:[%s5241_s1 + $0x40] sm:$0xff] }
0x12c8   :  { %4264 = vmatmul.mubr.msk.f32.vlgmr.msra.gmra.mxu1 %vm121_vm3, %v2346_v9  ;;  %4282 = vmatprep.subr.mxu0 %v4564_v2 }
0x12c9   :  { %4274 = vmatpush3.msra.mxu1 %v5007_v11  ;;  %4277 = vmatprep.mubr.msk.f32.mxu1 %vm4565_vm2, %v4564_v2 }
0x12ca   :  { %4275 = vmatprep.subr.mxu1 %v4564_v2  ;;  %4283 = vmatpush3.msra.mxu0 %v4714_v19  ;;  %v5037_v19 = vld [vmem:[%s5241_s1 + $0x28] sm:$0xff] }
0x12cb   :  { %4276 = vmatpush3.msra.mxu1 %v5017_v16  ;;  %v2631_v12 = vpop.permute.xlu0 %2630  ;;  %4294 = vmatprep.subr.mxu0 %v4564_v2 }
0x12cc   :  { %4278 = vmatmul.mubr.msk.f32.vlgmr.msra.gmra.mxu1 %vm121_vm3, %v2346_v9  ;;  %4285 = vmatmul.mubr.msk.f32.vlgmr.msra.gmra.mxu0 %vm121_vm3, %v2631_v12 }
0x12cd   :  { %4287 = vmatprep.subr.mxu1 %v4564_v2  ;;  %4291 = vmatprep.mubr.msk.f32.mxu1 %vm4565_vm2, %v4564_v2 }
0x12ce   :  { %4288 = vmatpush3.msra.mxu1 %v4727_v20  ;;  %4295 = vmatpush3.msra.mxu0 %v4950_v32  ;;  %v5048_v20 = vld [vmem:[%s5241_s1 + $0x20] sm:$0xff] }
0x12cf   :  { %4289 = vmatprep.subr.mxu1 %v4564_v2  ;;  %4296 = vmatprep.subr.mxu0 %v4564_v2 }
0x12d0   :  { %4290 = vmatpush3.msra.mxu1 %v4737_v21  ;;  %4297 = vmatpush3.msra.mxu0 %v4961_v26 }
0x12d1   :  { %4292 = vmatmul.mubr.msk.f32.vlgmr.msra.gmra.mxu1 %vm121_vm3, %v2457_v7  ;;  %4301 = vmatprep.subr.mxu1 %v4564_v2 }
0x12d2   :  { %4302 = vmatpush3.msra.mxu1 %v5037_v19  ;;  %4305 = vmatprep.mubr.msk.f32.mxu1 %vm4565_vm2, %v4564_v2 }
0x12d3   :  { %4303 = vmatprep.subr.mxu1 %v4564_v2  ;;  %4298 = vmatprep.mubr.msk.f32.mxu0 %vm4565_vm2, %v4564_v2 }
0x12d4   :  { %4304 = vmatpush3.msra.mxu1 %v5048_v20  ;;  %4308 = vmatprep.subr.mxu0 %v4564_v2 }
0x12d5   :  { %4315 = vmatprep.subr.mxu1 %v4564_v2 }
0x1386   :  { %v2526_v21 = vpop.f32.mrf.mxu0 }
0x1388   :  { %v2415_v32 = vpop.f32.mrf.mxu1  ;;  %v4272_v26 = vpop.f32.mrf.mxu0 }
0x1389   :  { %v2420_v15 = vrot.slane %v2415_v32, 4 }
0x138a   :  { %v4265_v17 = vpop.f32.mrf.mxu1 }
0x138b   :  { %v2422_v18 = vadd.f32 %v2420_v15, %v4626_v8 }
0x138c   :  { %v2596_v22 = vpop.f32.mrf.mxu1  ;;  %v2700_v23 = vpop.f32.mrf.mxu0 }
0x138d   :  { %v2597_v24 = vadd.f32 %v2596_v22, %v2526_v21  ;;  %2430 = vrot.lane.b32.xlu1 %v2422_v18, %s4566_s20  ;;  %v3934_v36 = vmul.f32 -1.442695, %v2422_v18  ;;  %v5092_v22 = vld [vmem:[%s5241_s1 + $0x38] sm:$0xff] }
0x138e   :  { %v4279_v25 = vpop.f32.mrf.mxu1  ;;  %v4286_v28 = vpop.f32.mrf.mxu0 }
0x138f   :  { %v2600_v29 = vadd.f32 %v5058_v13, %v2597_v24  ;;  %4476 = vpow2.f32 %v3934_v36  ;;  %v5119_v25 = vld [vmem:[%s5241_s1 + $0x58] sm:$0xff]  ;;  %v5128_v28 = vld [vmem:[%s5241_s1 + $0x50] sm:$0xff] }
0x1391   :  { %v2770_v14 = vpop.f32.mrf.mxu1  ;;  %2608 = vrot.lane.b32.xlu0 %v2600_v29, %s4566_s20  ;;  %v3937_v40 = vmul.f32 -1.442695, %v2600_v29 }
0x1392   :  { %v2771_v39 = vadd.f32 %v2770_v14, %v2700_v23  ;;  %v5106_v23 = vld [vmem:[%s5241_s1 + $0x30] sm:$0xff] }
0x1393   :  { %v4293_v31 = vpop.f32.mrf.mxu1  ;;  %4478 = vpow2.f32 %v3937_v40 }
0x1394   :  { %v2774_v35 = vadd.f32 %v4765_v38, %v2771_v39 }
0x1396   :  { %2782 = vrot.lane.b32.xlu1 %v2774_v35, %s4566_s20  ;;  %v3940_v41 = vmul.f32 -1.442695, %v2774_v35 }
0x1398   :  { %4480 = vpow2.f32 %v3940_v41 }
0x139c   :  { %v4477_v42 = vpop.eup %4476 }
0x139d   :  { %v2426_v43 = vadd.f32 1.0, %v4477_v42 }
0x139f   :  { %4482 = vrcp.f32 %v2426_v43 }
0x13a0   :  { %v4479_v44 = vpop.eup %4478 }
0x13a1   :  { %v2604_v45 = vadd.f32 1.0, %v4479_v44 }
0x13a3   :  { %4484 = vrcp.f32 %v2604_v45  ;;  %v5150_v45 = vld [vmem:[%s5241_s1 + $0xa] ss:$0 sm:$0xff] }
0x13a5   :  { %v4481_v46 = vpop.eup %4480 }
0x13a6   :  { %v2778_v47 = vadd.f32 1.0, %v4481_v46 }
0x13a8   :  { %4486 = vrcp.f32 %v2778_v47 }
0x13ac   :  { %v4483_v34 = vpop.eup %4482 }
0x13b0   :  { %v4485_v33 = vpop.eup %4484 }
0x13b5   :  { %v4487_v52 = vpop.eup %4486 }
0x13ff   :  { %v2431_v48 = vpop.permute.xlu1 %2430 }
0x1400   :  { %v2433_v38 = vmul.f32 %v4483_v34, %v2431_v48 }
0x1402   :  { %2435 = vrot.lane.b32.xlu0 %v2433_v38, %s4567_s21 }
0x1403   :  { %v2609_v49 = vpop.permute.xlu0 %2608 }
0x1404   :  { %v2611_v37 = vmul.f32 %v4485_v33, %v2609_v49 }
0x1406   :  { %2613 = vrot.lane.b32.xlu1 %v2611_v37, %s4567_s21 }
0x1408   :  { %v2783_v54 = vpop.permute.xlu1 %2782 }
0x1409   :  { %v2785_v55 = vmul.f32 %v4487_v52, %v2783_v54 }
0x140b   :  { %2787 = vrot.lane.b32.xlu0 %v2785_v55, %s4567_s21 }
0x1474   :  { %v2436_v56 = vpop.permute.xlu0 %2435 }
0x1475   :  { %v2438_v3 = vadd.f32 %v2436_v56, %v2422_v18 }
0x1477   :  { %4488 = vtanh.f32 %v2438_v3 }
0x1478   :  { %v2614_v5 = vpop.permute.xlu1 %2613 }
0x1479   :  { %v2616_v51 = vadd.f32 %v2614_v5, %v2600_v29 }
0x147b   :  { %4490 = vtanh.f32 %v2616_v51 }
0x147d   :  { %v2788_v57 = vpop.permute.xlu0 %2787 }
0x147e   :  { %v2790_v50 = vadd.f32 %v2788_v57, %v2774_v35 }
0x1480   :  { %4492 = vtanh.f32 %v2790_v50 }
0x1484   :  { %v4489_v59 = vpop.eup %4488 }
0x1485   :  { %v2441_v53 = vrot.slane %v4489_v59, 2 }
0x1487   :  { %v2443_v61 = vsub.f32 %v4988_v1, %v2441_v53 }
0x1488   :  { %v4491_v62 = vpop.eup %4490 }
0x1489   :  { %v2445_v30 = vrot.slane %v2443_v61, 6  ;;  %v2618_v58 = vsub.f32 %v4986_v27, %v4491_v62 }
0x148b   :  { %2446 = vrot.lane.b32.xlu1 %v2445_v30, %s4568_s22  ;;  %2620 = vrot.lane.b32.xlu0 %v2618_v58, %s4568_s22 }
0x148d   :  { %v4493_v63 = vpop.eup %4492 }
0x148e   :  { %v2792_v10 = vsub.f32 %v4994_v6, %v4493_v63 }
0x1490   :  { %2794 = vrot.lane.b32.xlu1 %v2792_v10, %s4568_s22 }
0x14fd   :  { %v2447_v0 = vpop.permute.xlu1 %2446  ;;  %v2621_v60 = vpop.permute.xlu0 %2620 }
0x14fe   :  { %v2449_v4 = vmul.f32 %v4483_v34, %v2447_v0  ;;  %v2623_v7 = vmul.f32 %v4485_v33, %v2621_v60 }
0x1500   :  { %2451 = vrot.lane.b32.xlu0 %v2449_v4, %s4569_s23  ;;  %2625 = vrot.lane.b32.xlu1 %v2623_v7, %s4569_s23 }
0x1502   :  { %v2795_v1 = vpop.permute.xlu1 %2794 }
0x1503   :  { %v2797_v9 = vmul.f32 %v4487_v52, %v2795_v1 }
0x1505   :  { %2799 = vrot.lane.b32.xlu0 %v2797_v9, %s4569_s23 }
0x1572   :  { %v2626_v27 = vpop.permute.xlu1 %2625  ;;  %v2452_v12 = vpop.permute.xlu0 %2451 }
0x1573   :  { %v5076_v21 = vadd.f32 %v4491_v62, %v2626_v27  ;;  %v5078_v32 = vadd.f32 %v4489_v59, %v2452_v12 }
0x1575   :  { %v2804_v6 = vrot.slane %v5078_v32, 4  ;;  %2916 = vrot.lane.b32.xlu0 %v5076_v21, %s4570_s28 }
0x1577   :  { %v2800_v26 = vpop.permute.xlu0 %2799  ;;  %2805 = vrot.lane.b32.xlu1 %v2804_v6, %s4570_s28 }
0x1578   :  { %v5084_v15 = vadd.f32 %v4493_v63, %v2800_v26 }
0x157b   :  { %3090 = vrot.lane.b32.xlu1 %v5084_v15, %s4570_s28 }
0x15e7   :  { %v2917_v17 = vpop.permute.xlu0 %2916 }
0x15e8   :  { %4306 = vmatmul.mubr.msk.f32.vlgmr.msra.gmra.mxu1 %vm121_vm3, %v2917_v17 }
0x15e9   :  { %v2806_v18 = vpop.permute.xlu1 %2805  ;;  %4316 = vmatpush3.msra.mxu1 %v5092_v22  ;;  %4319 = vmatprep.mubr.msk.f32.mxu1 %vm4565_vm2, %v4564_v2 }
0x15ea   :  { %4299 = vmatmul.mubr.msk.f32.vlgmr.msra.gmra.mxu0 %vm121_vm3, %v2806_v18  ;;  %4317 = vmatprep.subr.mxu1 %v4564_v2 }
0x15eb   :  { %4309 = vmatpush3.msra.mxu0 %v5007_v11  ;;  %4312 = vmatprep.mubr.msk.f32.mxu0 %vm4565_vm2, %v4564_v2 }
0x15ec   :  { %4310 = vmatprep.subr.mxu0 %v4564_v2  ;;  %4318 = vmatpush3.msra.mxu1 %v5106_v23 }
0x15ed   :  { %4311 = vmatpush3.msra.mxu0 %v5017_v16  ;;  %v3091_v24 = vpop.permute.xlu1 %3090  ;;  %4329 = vmatprep.subr.mxu1 %v4564_v2 }
0x15ee   :  { %4313 = vmatmul.mubr.msk.f32.vlgmr.msra.gmra.mxu0 %vm121_vm3, %v2806_v18  ;;  %4320 = vmatmul.mubr.msk.f32.vlgmr.msra.gmra.mxu1 %vm121_vm3, %v3091_v24 }
0x15ef   :  { %4322 = vmatprep.subr.mxu0 %v4564_v2  ;;  %4326 = vmatprep.mubr.msk.f32.mxu0 %vm4565_vm2, %v4564_v2 }
0x15f0   :  { %4323 = vmatpush3.msra.mxu0 %v5119_v25  ;;  %4330 = vmatpush3.msra.mxu1 %v5037_v19 }
0x15f1   :  { %4324 = vmatprep.subr.mxu0 %v4564_v2  ;;  %4331 = vmatprep.subr.mxu1 %v4564_v2 }
0x15f2   :  { %4325 = vmatpush3.msra.mxu0 %v5128_v28  ;;  %4332 = vmatpush3.msra.mxu1 %v5048_v20 }
0x15f3   :  { %4327 = vmatmul.mubr.msk.f32.vlgmr.msra.gmra.mxu0 %vm121_vm3, %v2917_v17  ;;  %4336 = vmatprep.subr.mxu0 %v4564_v2 }
0x15f4   :  { %4337 = vmatpush3.msra.mxu0 %v5007_v11  ;;  %4333 = vmatprep.mubr.msk.f32.mxu1 %vm4565_vm2, %v4564_v2 }
0x15f5   :  { %4338 = vmatprep.subr.mxu0 %v4564_v2  ;;  %4343 = vmatprep.subr.mxu1 %v4564_v2 }
0x15f6   :  { %4339 = vmatpush3.msra.mxu0 %v5017_v16  ;;  %4340 = vmatprep.mubr.msk.f32.mxu0 %vm4565_vm2, %v4564_v2 }
0x15f7   :  { %4350 = vmatprep.subr.mxu0 %v4564_v2 }
0x16a8   :  { %v2986_v19 = vpop.f32.mrf.mxu1 }
0x16aa   :  { %v2875_v20 = vpop.f32.mrf.mxu0  ;;  %v4307_v29 = vpop.f32.mrf.mxu1 }
0x16ab   :  { %v2880_v14 = vrot.slane %v2875_v20, 2 }
0x16ac   :  { %v4300_v39 = vpop.f32.mrf.mxu0 }
0x16ad   :  { %v2882_v11 = vadd.f32 %v2880_v14, %v4626_v8 }
0x16ae   :  { %v3056_v31 = vpop.f32.mrf.mxu0  ;;  %v3160_v35 = vpop.f32.mrf.mxu1 }
0x16af   :  { %v3057_v36 = vadd.f32 %v3056_v31, %v2986_v19  ;;  %2890 = vrot.lane.b32.xlu0 %v2882_v11, %s4566_s20  ;;  %v3942_v46 = vmul.f32 -1.442695, %v2882_v11 }
0x16b0   :  { %v4314_v40 = vpop.f32.mrf.mxu0  ;;  %v4321_v41 = vpop.f32.mrf.mxu1 }
0x16b1   :  { %v3060_v16 = vadd.f32 %v5058_v13, %v3057_v36  ;;  %4494 = vpow2.f32 %v3942_v46 }
0x16b3   :  { %v3230_v42 = vpop.f32.mrf.mxu0  ;;  %3068 = vrot.lane.b32.xlu1 %v3060_v16, %s4566_s20  ;;  %v3945_v47 = vmul.f32 -1.442695, %v3060_v16 }
0x16b4   :  { %v3231_v43 = vadd.f32 %v3230_v42, %v3160_v35 }
0x16b5   :  { %v4328_v44 = vpop.f32.mrf.mxu0  ;;  %4496 = vpow2.f32 %v3945_v47 }
0x16b6   :  { %v3234_v8 = vadd.f32 %v5150_v45, %v3231_v43 }
0x16b8   :  { %3242 = vrot.lane.b32.xlu0 %v3234_v8, %s4566_s20  ;;  %v3948_v34 = vmul.f32 -1.442695, %v3234_v8 }
0x16ba   :  { %4498 = vpow2.f32 %v3948_v34 }
0x16be   :  { %v4495_v48 = vpop.eup %4494 }
0x16bf   :  { %v2886_v38 = vadd.f32 1.0, %v4495_v48 }
0x16c1   :  { %4500 = vrcp.f32 %v2886_v38 }
0x16c2   :  { %v4497_v33 = vpop.eup %4496 }
0x16c3   :  { %v3064_v49 = vadd.f32 1.0, %v4497_v33 }
0x16c5   :  { %4502 = vrcp.f32 %v3064_v49 }
0x16c7   :  { %v4499_v37 = vpop.eup %4498 }
0x16c8   :  { %v3238_v52 = vadd.f32 1.0, %v4499_v37 }
0x16ca   :  { %4504 = vrcp.f32 %v3238_v52 }
0x16ce   :  { %v4501_v54 = vpop.eup %4500 }
0x16d2   :  { %v4503_v3 = vpop.eup %4502 }
0x16d7   :  { %v4505_v57 = vpop.eup %4504 }
0x1721   :  { %v2891_v55 = vpop.permute.xlu0 %2890 }
0x1722   :  { %v2893_v56 = vmul.f32 %v4501_v54, %v2891_v55 }
0x1724   :  { %2895 = vrot.lane.b32.xlu1 %v2893_v56, %s4567_s21 }
0x1725   :  { %v3069_v5 = vpop.permute.xlu1 %3068 }
0x1726   :  { %v3071_v51 = vmul.f32 %v4503_v3, %v3069_v5 }
0x1728   :  { %3073 = vrot.lane.b32.xlu0 %v3071_v51, %s4567_s21 }
0x172a   :  { %v3243_v50 = vpop.permute.xlu0 %3242 }
0x172b   :  { %v3245_v59 = vmul.f32 %v4505_v57, %v3243_v50 }
0x172d   :  { %3247 = vrot.lane.b32.xlu1 %v3245_v59, %s4567_s21 }
0x1796   :  { %v2896_v53 = vpop.permute.xlu1 %2895 }
0x1797   :  { %v2898_v61 = vadd.f32 %v2896_v53, %v2882_v11 }
0x1799   :  { %4506 = vtanh.f32 %v2898_v61 }
0x179a   :  { %v3074_v62 = vpop.permute.xlu0 %3073 }
0x179b   :  { %v3076_v30 = vadd.f32 %v3074_v62, %v3060_v16 }
0x179d   :  { %4508 = vtanh.f32 %v3076_v30 }
0x179f   :  { %v3248_v58 = vpop.permute.xlu1 %3247 }
0x17a0   :  { %v3250_v63 = vadd.f32 %v3248_v58, %v3234_v8 }
0x17a2   :  { %4510 = vtanh.f32 %v3250_v63 }
0x17a6   :  { %v4507_v10 = vpop.eup %4506 }
0x17a7   :  { %v2901_v0 = vrot.slane %v4507_v10, 2 }
0x17a9   :  { %v2903_v60 = vsub.f32 %v5078_v32, %v2901_v0 }
0x17aa   :  { %v4509_v4 = vpop.eup %4508 }
0x17ab   :  { %v2905_v7 = vrot.slane %v2903_v60, 6  ;;  %v3078_v1 = vsub.f32 %v5076_v21, %v4509_v4 }
0x17ad   :  { %2906 = vrot.lane.b32.xlu0 %v2905_v7, %s4568_s22  ;;  %3080 = vrot.lane.b32.xlu1 %v3078_v1, %s4568_s22 }
0x17af   :  { %v4511_v9 = vpop.eup %4510 }
0x17b0   :  { %v3252_v27 = vsub.f32 %v5084_v15, %v4511_v9 }
0x17b2   :  { %3254 = vrot.lane.b32.xlu0 %v3252_v27, %s4568_s22 }
0x181f   :  { %v2907_v12 = vpop.permute.xlu0 %2906  ;;  %v3081_v6 = vpop.permute.xlu1 %3080 }
0x1820   :  { %v2909_v26 = vmul.f32 %v4501_v54, %v2907_v12  ;;  %v3083_v17 = vmul.f32 %v4503_v3, %v3081_v6 }
0x1822   :  { %2911 = vrot.lane.b32.xlu1 %v2909_v26, %s4569_s23  ;;  %3085 = vrot.lane.b32.xlu0 %v3083_v17, %s4569_s23 }
0x1824   :  { %v3255_v32 = vpop.permute.xlu0 %3254 }
0x1825   :  { %v3257_v18 = vmul.f32 %v4505_v57, %v3255_v32 }
0x1827   :  { %3259 = vrot.lane.b32.xlu1 %v3257_v18, %s4569_s23 }
0x1894   :  { %v3086_v21 = vpop.permute.xlu0 %3085  ;;  %v2912_v24 = vpop.permute.xlu1 %2911 }
0x1895   :  { %v5166_v19 = vadd.f32 %v4509_v4, %v3086_v21  ;;  %v2914_v20 = vadd.f32 %v4507_v10, %v2912_v24 }
0x1897   :  { %v3339_v15 = vrot.slane %v2914_v20, 6  ;;  %3264 = vrot.lane.b32.xlu0 %v5166_v19, %s4570_s28 }
0x1899   :  { %v3260_v29 = vpop.permute.xlu1 %3259  ;;  %3340 = vrot.lane.b32.xlu1 %v3339_v15, %s4570_s28 }
0x189a   :  { %v5171_v14 = vadd.f32 %v4511_v9, %v3260_v29 }
0x189c   :  { %3444 = vrot.lane.b32.xlu0 %v5171_v14, %s4570_s28 }
0x1909   :  { %v3265_v39 = vpop.permute.xlu0 %3264 }
0x190a   :  { %4334 = vmatmul.mubr.msk.f32.vlgmr.msra.gmra.mxu1 %vm121_vm3, %v3265_v39 }
0x190b   :  { %4344 = vmatpush3.msra.mxu1 %v5092_v22  ;;  %v3341_v11 = vpop.permute.xlu1 %3340  ;;  %4347 = vmatprep.mubr.msk.f32.mxu1 %vm4565_vm2, %v4564_v2 }
0x190c   :  { %4341 = vmatmul.mubr.msk.f32.vlgmr.msra.gmra.mxu0 %vm121_vm3, %v3341_v11  ;;  %4345 = vmatprep.subr.mxu1 %v4564_v2 }
0x190d   :  { %4351 = vmatpush3.msra.mxu0 %v5119_v25  ;;  %4346 = vmatpush3.msra.mxu1 %v5106_v23 }
0x190e   :  { %v3445_v31 = vpop.permute.xlu0 %3444  ;;  %4352 = vmatprep.subr.mxu0 %v4564_v2  ;;  %4354 = vmatprep.mubr.msk.f32.mxu0 %vm4565_vm2, %v4564_v2 }
0x190f   :  { %4348 = vmatmul.mubr.msk.f32.vlgmr.msra.gmra.mxu1 %vm121_vm3, %v3445_v31  ;;  %4353 = vmatpush3.msra.mxu0 %v5128_v28 }
0x1910   :  { %4355 = vmatmul.mubr.msk.f32.vlgmr.msra.gmra.mxu0 %vm121_vm3, %v3265_v39  ;;  %4364 = vmatprep.subr.mxu0 %v4564_v2 }
0x1911   :  { %4365 = vmatpush3.msra.mxu0 %v5119_v25  ;;  %4357 = vmatprep.subr.mxu1 %v4564_v2 }
0x1912   :  { %4366 = vmatprep.subr.mxu0 %v4564_v2  ;;  %4368 = vmatprep.mubr.msk.f32.mxu0 %vm4565_vm2, %v4564_v2 }
0x1913   :  { %4367 = vmatpush3.msra.mxu0 %v5128_v28  ;;  %4358 = vmatpush3.msra.mxu1 %v5092_v22 }
0x1914   :  { %4359 = vmatprep.subr.mxu1 %v4564_v2  ;;  %4361 = vmatprep.mubr.msk.f32.mxu1 %vm4565_vm2, %v4564_v2 }
0x1915   :  { %4360 = vmatpush3.msra.mxu1 %v5106_v23 }
0x1916   :  { %4371 = vmatprep.subr.mxu1 %v4564_v2 }
0x19ca   :  { %v3334_v25 = vpop.f32.mrf.mxu1 }
0x19cc   :  { %v4335_v35 = vpop.f32.mrf.mxu1  ;;  %v3410_v36 = vpop.f32.mrf.mxu0 }
0x19cd   :  { %v3411_v40 = vadd.f32 %v3410_v36, %v3334_v25  ;;  %v3958_v36 = vld [vmem:[%s5241_s1 + $0x70] ss:$0 sm:$0xff] }
0x19ce   :  { %v4342_v41 = vpop.f32.mrf.mxu0 }
0x19cf   :  { %v3414_v16 = vadd.f32 %v5058_v13, %v3411_v40  ;;  %v3514_v42 = vpop.f32.mrf.mxu1 }
0x19d0   :  { %v3584_v28 = vpop.f32.mrf.mxu0 }
0x19d1   :  { %v4349_v43 = vpop.f32.mrf.mxu1  ;;  %v3585_v22 = vadd.f32 %v3584_v28, %v3514_v42  ;;  %3422 = vrot.lane.b32.xlu1 %v3414_v16, %s4566_s20  ;;  %v3951_v23 = vmul.f32 -1.442695, %v3414_v16 }
0x19d2   :  { %v4356_v44 = vpop.f32.mrf.mxu0 }
0x19d3   :  { %v3588_v8 = vadd.f32 %v5150_v45, %v3585_v22  ;;  %4512 = vpow2.f32 %v3951_v23 }
0x19d5   :  { %3596 = vrot.lane.b32.xlu0 %v3588_v8, %s4566_s20  ;;  %v3954_v46 = vmul.f32 -1.442695, %v3588_v8 }
0x19d7   :  { %4514 = vpow2.f32 %v3954_v46 }
0x19e0   :  { %v4513_v47 = vpop.eup %4512 }
0x19e1   :  { %v3418_v34 = vadd.f32 1.0, %v4513_v47 }
0x19e3   :  { %4516 = vrcp.f32 %v3418_v34 }
0x19e4   :  { %v4515_v48 = vpop.eup %4514 }
0x19e5   :  { %v3592_v13 = vadd.f32 1.0, %v4515_v48 }
0x19e7   :  { %4518 = vrcp.f32 %v3592_v13 }
0x19f0   :  { %v4517_v38 = vpop.eup %4516 }
0x19f4   :  { %v4519_v37 = vpop.eup %4518 }
0x1a43   :  { %v3423_v33 = vpop.permute.xlu1 %3422 }
0x1a44   :  { %v3425_v49 = vmul.f32 %v4517_v38, %v3423_v33 }
0x1a46   :  { %3427 = vrot.lane.b32.xlu1 %v3425_v49, %s4567_s21 }
0x1a47   :  { %v3597_v52 = vpop.permute.xlu0 %3596 }
0x1a48   :  { %v3599_v54 = vmul.f32 %v4519_v37, %v3597_v52 }
0x1a4a   :  { %3601 = vrot.lane.b32.xlu0 %v3599_v54, %s4567_s21 }
0x1ab8   :  { %v3428_v55 = vpop.permute.xlu1 %3427 }
0x1ab9   :  { %v3430_v56 = vadd.f32 %v3428_v55, %v3414_v16 }
0x1abb   :  { %4520 = vtanh.f32 %v3430_v56 }
0x1abc   :  { %v3602_v3 = vpop.permute.xlu0 %3601 }
0x1abd   :  { %v3604_v5 = vadd.f32 %v3602_v3, %v3588_v8 }
0x1abf   :  { %4522 = vtanh.f32 %v3604_v5 }
0x1ac8   :  { %v4521_v51 = vpop.eup %4520 }
0x1ac9   :  { %v3432_v57 = vsub.f32 %v5166_v19, %v4521_v51 }
0x1acb   :  { %3434 = vrot.lane.b32.xlu1 %v3432_v57, %s4568_s22 }
0x1acc   :  { %v4523_v50 = vpop.eup %4522 }
0x1acd   :  { %v3606_v59 = vsub.f32 %v5171_v14, %v4523_v50  ;;  %v26_v14 = vld [vmem:[%s5241_s1 + $0x60] sm:$0xff] }
0x1acf   :  { %3608 = vrot.lane.b32.xlu0 %v3606_v59, %s4568_s22 }
0x1b3d   :  { %v3435_v53 = vpop.permute.xlu1 %3434 }
0x1b3e   :  { %v3437_v61 = vmul.f32 %v4517_v38, %v3435_v53 }
0x1b40   :  { %3439 = vrot.lane.b32.xlu1 %v3437_v61, %s4569_s23 }
0x1b41   :  { %v3609_v62 = vpop.permute.xlu0 %3608 }
0x1b42   :  { %v3611_v30 = vmul.f32 %v4519_v37, %v3609_v62 }
0x1b44   :  { %3613 = vrot.lane.b32.xlu0 %v3611_v30, %s4569_s23 }
0x1bb2   :  { %v3440_v58 = vpop.permute.xlu1 %3439 }
0x1bb3   :  { %v3442_v63 = vadd.f32 %v4521_v51, %v3440_v58 }
0x1bb5   :  { %3693 = vrot.lane.b32.xlu0 %v3442_v63, %s4570_s28 }
0x1bb6   :  { %v3614_v10 = vpop.permute.xlu0 %3613 }
0x1bb7   :  { %v3616_v0 = vadd.f32 %v4523_v50, %v3614_v10 }
0x1bb9   :  { %3618 = vrot.lane.b32.xlu1 %v3616_v0, %s4570_s28 }
0x1c27   :  { %v3694_v60 = vpop.permute.xlu0 %3693 }
0x1c28   :  { %4369 = vmatmul.mubr.msk.f32.vlgmr.msra.gmra.mxu0 %vm121_vm3, %v3694_v60 }
0x1c2b   :  { %v3619_v4 = vpop.permute.xlu1 %3618 }
0x1c2c   :  { %4362 = vmatmul.mubr.msk.f32.vlgmr.msra.gmra.mxu1 %vm121_vm3, %v3619_v4 }
0x1c2d   :  { %4375 = vmatprep.mubr.msk.f32.mxu1 %vm4565_vm2, %v4564_v2 }
0x1ce8   :  { %v3763_v7 = vpop.f32.mrf.mxu0 }
0x1cea   :  { %v4370_v1 = vpop.f32.mrf.mxu0 }
0x1cec   :  { %v3688_v9 = vpop.f32.mrf.mxu1 }
0x1ced   :  { %v3764_v27 = vadd.f32 %v3763_v7, %v3688_v9 }
0x1cee   :  { %v4363_v12 = vpop.f32.mrf.mxu1 }
0x1cef   :  { %v3767_v6 = vadd.f32 %v5150_v45, %v3764_v27  ;;  %v27_v45 = vld [vmem:[%s5241_s1 + $0x68] sm:$0xff] }
0x1cf0   :  { %4372 = vmatpush3.msra.mxu1 %v27_v45 }
0x1cf1   :  { %3775 = vrot.lane.b32.xlu1 %v3767_v6, %s4566_s20  ;;  %v3957_v26 = vmul.f32 -1.442695, %v3767_v6  ;;  %4373 = vmatprep.subr.mxu1 %v4564_v2 }
0x1cf2   :  { %4374 = vmatpush3.msra.mxu1 %v26_v14 }
0x1cf3   :  { %4524 = vpow2.f32 %v3957_v26 }
0x1d00   :  { %v4525_v17 = vpop.eup %4524 }
0x1d01   :  { %v3771_v32 = vadd.f32 1.0, %v4525_v17 }
0x1d03   :  { %4526 = vrcp.f32 %v3771_v32 }
0x1d10   :  { %v4527_v18 = vpop.eup %4526 }
0x1d63   :  { %v3776_v21 = vpop.permute.xlu1 %3775 }
0x1d64   :  { %v3778_v24 = vmul.f32 %v4527_v18, %v3776_v21 }
0x1d66   :  { %3780 = vrot.lane.b32.xlu0 %v3778_v24, %s4567_s21 }
0x1dd8   :  { %v3781_v19 = vpop.permute.xlu0 %3780 }
0x1dd9   :  { %v3783_v20 = vadd.f32 %v3781_v19, %v3767_v6 }
0x1ddb   :  { %4528 = vtanh.f32 %v3783_v20 }
0x1de8   :  { %v4529_v15 = vpop.eup %4528 }
0x1de9   :  { %v3785_v29 = vsub.f32 %v3616_v0, %v4529_v15 }
0x1deb   :  { %3787 = vrot.lane.b32.xlu1 %v3785_v29, %s4568_s22 }
0x1e5d   :  { %v3788_v39 = vpop.permute.xlu1 %3787 }
0x1e5e   :  { %v3790_v11 = vmul.f32 %v4527_v18, %v3788_v39 }
0x1e60   :  { %3792 = vrot.lane.b32.xlu0 %v3790_v11, %s4569_s23  ;;  %s4542_s23 = scalar_lea.vmem %s3884_s24, 32 }
0x1e61   :  { %p4543_p0 = scmp.ne.s32.totalorder %s3884_s24, %s4542_s23  ;;  %p4548_p2 = scmp.lt.s32.totalorder %s4542_s23, %s4542_s23 }
0x1e63   :  { %p4549_p3 = por %p4548_p2, %p4547_p1 }
0x1e65   :  { %p4550_p4 = pnand %p4549_p3, %p4543_p0 }
0x1ed2   :  { %v3793_v31 = vpop.permute.xlu0 %3792 }
0x1ed3   :  { %v3795_v25 = vadd.f32 %v4529_v15, %v3793_v31 }
0x1ed5   :  { %3801 = vrot.lane.b32.xlu1 %v3795_v25, %s4570_s28 }
0x1f47   :  { %v3802_v35 = vpop.permute.xlu1 %3801 }
0x1f48   :  { %4376 = vmatmul.mubr.msk.f32.vlgmr.msra.gmra.mxu1 %vm121_vm3, %v3802_v35 }
0x2008   :  { %v3871_v40 = vpop.f32.mrf.mxu1 }
0x2009   :  { %v3872_v2 = vadd.f32 %v3958_v36, %v3871_v40 }
0x200a   :  { %v4377_v41 = vpop.f32.mrf.mxu1 }
0x200b   :  { %3876 = vst.msk [vmem:[#allocation2] sm:$0x3] %vm3875_vm4, %v3872_v2 }
0x200c   :  { %4553 = shalt.err (!%p4550_p4)
}
0x200d   :  { %3886 = dma.vmem_to_hbm [thread:$0]  %s3884_s24, 32, %s5242_s2, [#allocation3]  }
0x200e   :  { %4562 = dma.done.wait [#allocation3], 32  }
0x200f   :  { %4563 = vsyncadd [#allocation3], 4294967264 }
0x2010   :  { %3890 = vsyncpa [#allocation3], 1 }

</bundles_post_ra>
